<compile_context>
chip_gen: v7x
topology: tpu7x:2x2x1
jax: 0.10.0
libtpu: 0.0.40
codegen_flags: <defaults>
</compile_context>

<pallas_src>
import functools

import jax
import jax.numpy as jnp
from jax import lax
from jax.experimental import pallas as pl
from jax.experimental.pallas import tpu as pltpu


def _linear_attention_kernel(x_ref, wqkv_ref, wout_ref, bout_ref, o_ref,
                             qkv_scr, *, heads, dim_head, scale):
    hid = heads * dim_head

    # Load the (dim, L) f32 tile and cast to bf16 in-kernel (MXU operand).
    x = x_ref[0].astype(jnp.bfloat16)                            # (dim, L)

    # to_qkv: 1x1 conv (no bias) == W_qkv @ x.  One big MXU GEMM with f32
    # accumulation, streamed into a bf16 VMEM scratch (no full f32 SSA value).
    qkv_scr[...] = jnp.dot(
        wqkv_ref[...], x,
        preferred_element_type=jnp.float32).astype(jnp.bfloat16)  # (3*hid, L)

    w_eff_parts = []
    for h in range(heads):                                       # static, small
        lo = h * dim_head

        # Only the current head's k slice is held in f32 (for max/exp).
        k_h = qkv_scr[hid + lo:hid + lo + dim_head, :].astype(jnp.float32)
        v_h = qkv_scr[2 * hid + lo:2 * hid + lo + dim_head, :]   # (dh, L) bf16

        # Softmax over the sequence (lane) axis; exp in f32 (values <= 1).
        k_h = k_h - jnp.max(k_h, axis=-1, keepdims=True)
        k_e = jnp.exp(k_h)                                        # (dh, L) f32
        inv = pl.reciprocal(jnp.sum(k_e, axis=-1, keepdims=True),
                            approx=True)                          # (dh, 1) f32

        # ctx[d, e] = sum_n exp(k)[d, n] * v[e, n]   (contract the L lane axis)
        ctx = lax.dot_general(k_e.astype(jnp.bfloat16), v_h,
                              (((1,), (1,)), ((), ())),
                              preferred_element_type=jnp.float32)  # (dh, dh)
        # Fold the softmax denominator and the q scale into the tiny ctx.
        ctx = ctx * (inv * scale)                                  # (dh,1) bcast

        # Fuse ctx into the output projection (L-independent):
        #   W_eff_h[o, d] = sum_e W_out[o, h*dh + e] * ctx[d, e]
        w_out_h = wout_ref[:, lo:lo + dim_head]                   # (dim, dh)
        w_eff_h = lax.dot_general(w_out_h, ctx.astype(jnp.bfloat16),
                                  (((1,), (1,)), ((), ())),
                                  preferred_element_type=jnp.float32)
        w_eff_parts.append(w_eff_h.astype(jnp.bfloat16))          # (dim, dh)

    w_eff = jnp.concatenate(w_eff_parts, axis=1)                  # (dim, hid)

    # to_out fused with the attention read-out: y = W_eff @ q + b.
    q_all = qkv_scr[0:hid, :]                                     # (hid, L) bf16
    y = jnp.dot(w_eff, q_all, preferred_element_type=jnp.float32)
    y = y + bout_ref[...]                                         # (dim, L) f32
    o_ref[0] = y.astype(o_ref.dtype)


def _vmem_limit_bytes():
    """Generation-aware scoped-VMEM limit (headroom on v7x's 64 MiB)."""
    cap = 128 * 1024 * 1024
    try:
        cap = int(pltpu.get_tpu_info().vmem_capacity_bytes)
    except Exception:
        pass
    return max(32 * 1024 * 1024, min((cap * 3) // 5, 96 * 1024 * 1024))


def linear_attention(x, w_qkv, w_out, b_out, *, heads, dim_head,
                     out_dtype=jnp.bfloat16):
    """x: (B, dim, L) float32 (NCL, like torch Conv1d).  Returns (B, dim, L)."""
    B, dim, L = x.shape
    hid = heads * dim_head
    scale = dim_head ** (-0.5)

    # Weights are tiny: cast once host-side; x stays f32 (cast in-kernel).
    wqkv_bf = w_qkv.astype(jnp.bfloat16)                     # (3*hid, dim)
    wout_bf = w_out.astype(jnp.bfloat16)                     # (dim, hid)
    bout = b_out.reshape(dim, 1).astype(jnp.float32)         # (dim, 1)

    kernel = functools.partial(_linear_attention_kernel,
                               heads=heads, dim_head=dim_head, scale=scale)

    flops = B * (2 * dim * (3 * hid) * L          # qkv projection
                 + 2 * hid * dim_head * L         # per-head ctx Grams
                 + 2 * dim * dim_head * hid       # W_eff (L-independent)
                 + 2 * dim * hid * L)             # fused output GEMM
    bytes_accessed = (B * dim * L * 4                                  # x in
                      + B * dim * L * jnp.dtype(out_dtype).itemsize    # y out
                      + wqkv_bf.size * 2 + wout_bf.size * 2 + dim * 4)
    cost = pl.CostEstimate(flops=int(flops),
                           transcendentals=int(B * hid * L),
                           bytes_accessed=int(bytes_accessed))

    out = pl.pallas_call(
        kernel,
        out_shape=jax.ShapeDtypeStruct((B, dim, L), out_dtype),
        grid_spec=pltpu.PrefetchScalarGridSpec(
            num_scalar_prefetch=0,
            grid=(B,),
            in_specs=[
                pl.BlockSpec((1, dim, L), lambda b: (b, 0, 0)),
                pl.BlockSpec((3 * hid, dim), lambda b: (0, 0)),
                pl.BlockSpec((dim, hid), lambda b: (0, 0)),
                pl.BlockSpec((dim, 1), lambda b: (0, 0)),
            ],
            out_specs=pl.BlockSpec((1, dim, L), lambda b: (b, 0, 0)),
            scratch_shapes=[pltpu.VMEM((3 * hid, L), jnp.bfloat16)],
        ),
        compiler_params=pltpu.CompilerParams(
            dimension_semantics=("parallel",),
            vmem_limit_bytes=_vmem_limit_bytes()),
        cost_estimate=cost,
    )(x, wqkv_bf, wout_bf, bout)

    return out                                                # (B, dim, L)


def _reference(x, w_qkv, w_out, b_out, *, heads, dim_head):
    """Pure-JAX f32 reference mirroring the torch module (for verification)."""
    B, dim, L = x.shape
    hid = heads * dim_head
    scale = dim_head ** (-0.5)
    qkv = jnp.einsum('oc,bcl->bol', w_qkv, x)                 # (B, 3*hid, L)
    q, k, v = jnp.split(qkv, 3, axis=1)
    rearr = lambda t: t.reshape(B, heads, dim_head, L)
    q, k, v = rearr(q) * scale, rearr(k), rearr(v)
    k = jax.nn.softmax(k, axis=-1)
    context = jnp.einsum('bhdn,bhen->bhde', k, v)
    out = jnp.einsum('bhde,bhdn->bhen', context, q)
    out = out.reshape(B, hid, L)
    return jnp.einsum('oc,bcl->bol', w_out, out) + b_out[None, :, None]


if __name__ == "__main__":
    B, dim, L = 2, 4, 16
    heads, dim_head = 4, 32
    hid = heads * dim_head

    key = jax.random.PRNGKey(0)
    kx, k1, k2, k3 = jax.random.split(key, 4)

    x = jax.random.normal(kx, (B, dim, L), dtype=jnp.float32)

    # Deterministic parameter init (Conv1d kernel-size-1 weights, squeezed).
    bound_qkv = 1.0 / (dim ** 0.5)
    w_qkv = jax.random.uniform(k1, (3 * hid, dim), jnp.float32,
                               -bound_qkv, bound_qkv)
    bound_out = 1.0 / (hid ** 0.5)
    w_out = jax.random.uniform(k2, (dim, hid), jnp.float32,
                               -bound_out, bound_out)
    b_out = jax.random.uniform(k3, (dim,), jnp.float32,
                               -bound_out, bound_out)

    y = linear_attention(x, w_qkv, w_out, b_out,
                         heads=heads, dim_head=dim_head)
    y = jax.block_until_ready(y)
    assert y.shape == (B, dim, L)

    y32 = y.astype(jnp.float32)
    y_ref = _reference(x, w_qkv, w_out, b_out, heads=heads, dim_head=dim_head)
    # Relaxed tolerance: bf16 MXU operands / bf16 output, f32 accumulation,
    # approx reciprocal in the softmax denominator.
    max_err = float(jnp.max(jnp.abs(y32 - y_ref)))
    assert jnp.allclose(y32, y_ref, atol=3e-2, rtol=3e-2), max_err

    print("KERNEL_OK")
</pallas_src>

<mosaic_0001>
module attributes {stable_mosaic.version = 11 : i64} {
  func.func @_linear_attention_kernel(%arg0: i32, %arg1: memref<1x4x16xf32, #tpu.memory_space<vmem>>, %arg2: memref<384x4xbf16, #tpu.memory_space<vmem>>, %arg3: memref<4x128xbf16, #tpu.memory_space<vmem>>, %arg4: memref<4x1xf32, #tpu.memory_space<vmem>>, %arg5: memref<1x4x16xbf16, #tpu.memory_space<vmem>>, %arg6: memref<384x16xbf16, #tpu.memory_space<vmem>>) attributes {dimension_semantics = [#tpu.dimension_semantics<parallel>], iteration_bounds = array<i64: 2>, scalar_prefetch = 0 : i64, scratch_operands = 1 : i64, tpu.core_type = #tpu.core_type<tc>, window_params = [{transform_indices = @transform_0, window_bounds = array<i64: 1, 4, 16>}, {pipeline_mode = #tpu.pipeline_mode<synchronous>, transform_indices = @transform_1, window_bounds = array<i64: 384, 4>}, {pipeline_mode = #tpu.pipeline_mode<synchronous>, transform_indices = @transform_2, window_bounds = array<i64: 4, 128>}, {pipeline_mode = #tpu.pipeline_mode<synchronous>, transform_indices = @transform_3, window_bounds = array<i64: 4, 1>}, {transform_indices = @transform_4, window_bounds = array<i64: 1, 4, 16>}]} {
    %c0 = arith.constant 0 : index
    %c0_0 = arith.constant 0 : index
    %c0_1 = arith.constant 0 : index
    %0 = vector.load %arg1[%c0, %c0_0, %c0_1] : memref<1x4x16xf32, #tpu.memory_space<vmem>>, vector<1x4x16xf32>
    %1 = vector.shape_cast %0 : vector<1x4x16xf32> to vector<4x16xf32>
    %2 = arith.truncf %1 : vector<4x16xf32> to vector<4x16xbf16>
    %c0_2 = arith.constant 0 : index
    %c0_3 = arith.constant 0 : index
    %3 = vector.load %arg2[%c0_2, %c0_3] : memref<384x4xbf16, #tpu.memory_space<vmem>>, vector<384x4xbf16>
    %cst = arith.constant dense<0.000000e+00> : vector<384x16xf32>
    %4 = tpu.matmul %3, %2, %cst {dimension_numbers = #tpu.dot_dimension_numbers<[1], [0], [0], [1], [0, 0, 1, 1], [], []>} : vector<384x4xbf16>, vector<4x16xbf16>, vector<384x16xf32> -> vector<384x16xf32>
    %5 = arith.truncf %4 : vector<384x16xf32> to vector<384x16xbf16>
    %c0_4 = arith.constant 0 : index
    %c0_5 = arith.constant 0 : index
    %6 = vector.load %arg6[%c0_4, %c0_5] : memref<384x16xbf16, #tpu.memory_space<vmem>>, vector<384x16xbf16>
    tpu.vector_store %arg6[%c0_4, %c0_5], %5 {strides = array<i32>} : memref<384x16xbf16, #tpu.memory_space<vmem>>, vector<384x16xbf16>,
    %c128 = arith.constant 128 : index
    %c0_6 = arith.constant 0 : index
    %7 = vector.load %arg6[%c128, %c0_6] : memref<384x16xbf16, #tpu.memory_space<vmem>>, vector<32x16xbf16>
    %8 = arith.extf %7 : vector<32x16xbf16> to vector<32x16xf32>
    %c256 = arith.constant 256 : index
    %c0_7 = arith.constant 0 : index
    %9 = vector.load %arg6[%c256, %c0_7] : memref<384x16xbf16, #tpu.memory_space<vmem>>, vector<32x16xbf16>
    %cst_8 = arith.constant dense<0xFF800000> : vector<32xf32>
    %10 = vector.multi_reduction <maximumf>, %8, %cst_8 [1] : vector<32x16xf32> to vector<32xf32>
    %11 = vector.shape_cast %10 : vector<32xf32> to vector<32x1xf32>
    %12 = vector.broadcast %11 : vector<32x1xf32> to vector<32x16xf32>
    %13 = arith.subf %8, %12 : vector<32x16xf32>
    %14 = math.exp %13 : vector<32x16xf32>
    %cst_9 = arith.constant dense<0.000000e+00> : vector<32xf32>
    %15 = vector.multi_reduction <add>, %14, %cst_9 [1] : vector<32x16xf32> to vector<32xf32>
    %16 = vector.shape_cast %15 : vector<32xf32> to vector<32x1xf32>
    %17 = tpu.reciprocal %16 {approx = true} : vector<32x1xf32> -> vector<32x1xf32>
    %18 = arith.truncf %14 : vector<32x16xf32> to vector<32x16xbf16>
    %cst_10 = arith.constant dense<0.000000e+00> : vector<32x32xf32>
    %19 = tpu.matmul %18, %9, %cst_10 {dimension_numbers = #tpu.dot_dimension_numbers<[1], [1], [0], [0], [0, 0, 1, 0], [], []>} : vector<32x16xbf16>, vector<32x16xbf16>, vector<32x32xf32> -> vector<32x32xf32>
    %cst_11 = arith.constant 0.176776692 : f32
    %20 = vector.broadcast %cst_11 : f32 to vector<32x1xf32>
    %21 = arith.mulf %17, %20 : vector<32x1xf32>
    %22 = vector.broadcast %21 : vector<32x1xf32> to vector<32x32xf32>
    %23 = arith.mulf %19, %22 : vector<32x32xf32>
    %c0_12 = arith.constant 0 : index
    %c0_13 = arith.constant 0 : index
    %24 = vector.load %arg3[%c0_12, %c0_13] : memref<4x128xbf16, #tpu.memory_space<vmem>>, vector<4x32xbf16>
    %25 = arith.truncf %23 : vector<32x32xf32> to vector<32x32xbf16>
    %cst_14 = arith.constant dense<0.000000e+00> : vector<4x32xf32>
    %26 = tpu.matmul %24, %25, %cst_14 {dimension_numbers = #tpu.dot_dimension_numbers<[1], [1], [0], [0], [0, 0, 1, 0], [], []>} : vector<4x32xbf16>, vector<32x32xbf16>, vector<4x32xf32> -> vector<4x32xf32>
    %27 = arith.truncf %26 : vector<4x32xf32> to vector<4x32xbf16>
    %c160 = arith.constant 160 : index
    %c0_15 = arith.constant 0 : index
    %28 = vector.load %arg6[%c160, %c0_15] : memref<384x16xbf16, #tpu.memory_space<vmem>>, vector<32x16xbf16>
    %29 = arith.extf %28 : vector<32x16xbf16> to vector<32x16xf32>
    %c288 = arith.constant 288 : index
    %c0_16 = arith.constant 0 : index
    %30 = vector.load %arg6[%c288, %c0_16] : memref<384x16xbf16, #tpu.memory_space<vmem>>, vector<32x16xbf16>
    %cst_17 = arith.constant dense<0xFF800000> : vector<32xf32>
    %31 = vector.multi_reduction <maximumf>, %29, %cst_17 [1] : vector<32x16xf32> to vector<32xf32>
    %32 = vector.shape_cast %31 : vector<32xf32> to vector<32x1xf32>
    %33 = vector.broadcast %32 : vector<32x1xf32> to vector<32x16xf32>
    %34 = arith.subf %29, %33 : vector<32x16xf32>
    %35 = math.exp %34 : vector<32x16xf32>
    %cst_18 = arith.constant dense<0.000000e+00> : vector<32xf32>
    %36 = vector.multi_reduction <add>, %35, %cst_18 [1] : vector<32x16xf32> to vector<32xf32>
    %37 = vector.shape_cast %36 : vector<32xf32> to vector<32x1xf32>
    %38 = tpu.reciprocal %37 {approx = true} : vector<32x1xf32> -> vector<32x1xf32>
    %39 = arith.truncf %35 : vector<32x16xf32> to vector<32x16xbf16>
    %cst_19 = arith.constant dense<0.000000e+00> : vector<32x32xf32>
    %40 = tpu.matmul %39, %30, %cst_19 {dimension_numbers = #tpu.dot_dimension_numbers<[1], [1], [0], [0], [0, 0, 1, 0], [], []>} : vector<32x16xbf16>, vector<32x16xbf16>, vector<32x32xf32> -> vector<32x32xf32>
    %cst_20 = arith.constant 0.176776692 : f32
    %41 = vector.broadcast %cst_20 : f32 to vector<32x1xf32>
    %42 = arith.mulf %38, %41 : vector<32x1xf32>
    %43 = vector.broadcast %42 : vector<32x1xf32> to vector<32x32xf32>
    %44 = arith.mulf %40, %43 : vector<32x32xf32>
    %c0_21 = arith.constant 0 : index
    %c32 = arith.constant 32 : index
    %45 = vector.load %arg3[%c0_21, %c32] : memref<4x128xbf16, #tpu.memory_space<vmem>>, vector<4x32xbf16>
    %46 = arith.truncf %44 : vector<32x32xf32> to vector<32x32xbf16>
    %cst_22 = arith.constant dense<0.000000e+00> : vector<4x32xf32>
    %47 = tpu.matmul %45, %46, %cst_22 {dimension_numbers = #tpu.dot_dimension_numbers<[1], [1], [0], [0], [0, 0, 1, 0], [], []>} : vector<4x32xbf16>, vector<32x32xbf16>, vector<4x32xf32> -> vector<4x32xf32>
    %48 = arith.truncf %47 : vector<4x32xf32> to vector<4x32xbf16>
    %c192 = arith.constant 192 : index
    %c0_23 = arith.constant 0 : index
    %49 = vector.load %arg6[%c192, %c0_23] : memref<384x16xbf16, #tpu.memory_space<vmem>>, vector<32x16xbf16>
    %50 = arith.extf %49 : vector<32x16xbf16> to vector<32x16xf32>
    %c320 = arith.constant 320 : index
    %c0_24 = arith.constant 0 : index
    %51 = vector.load %arg6[%c320, %c0_24] : memref<384x16xbf16, #tpu.memory_space<vmem>>, vector<32x16xbf16>
    %cst_25 = arith.constant dense<0xFF800000> : vector<32xf32>
    %52 = vector.multi_reduction <maximumf>, %50, %cst_25 [1] : vector<32x16xf32> to vector<32xf32>
    %53 = vector.shape_cast %52 : vector<32xf32> to vector<32x1xf32>
    %54 = vector.broadcast %53 : vector<32x1xf32> to vector<32x16xf32>
    %55 = arith.subf %50, %54 : vector<32x16xf32>
    %56 = math.exp %55 : vector<32x16xf32>
    %cst_26 = arith.constant dense<0.000000e+00> : vector<32xf32>
    %57 = vector.multi_reduction <add>, %56, %cst_26 [1] : vector<32x16xf32> to vector<32xf32>
    %58 = vector.shape_cast %57 : vector<32xf32> to vector<32x1xf32>
    %59 = tpu.reciprocal %58 {approx = true} : vector<32x1xf32> -> vector<32x1xf32>
    %60 = arith.truncf %56 : vector<32x16xf32> to vector<32x16xbf16>
    %cst_27 = arith.constant dense<0.000000e+00> : vector<32x32xf32>
    %61 = tpu.matmul %60, %51, %cst_27 {dimension_numbers = #tpu.dot_dimension_numbers<[1], [1], [0], [0], [0, 0, 1, 0], [], []>} : vector<32x16xbf16>, vector<32x16xbf16>, vector<32x32xf32> -> vector<32x32xf32>
    %cst_28 = arith.constant 0.176776692 : f32
    %62 = vector.broadcast %cst_28 : f32 to vector<32x1xf32>
    %63 = arith.mulf %59, %62 : vector<32x1xf32>
    %64 = vector.broadcast %63 : vector<32x1xf32> to vector<32x32xf32>
    %65 = arith.mulf %61, %64 : vector<32x32xf32>
    %c0_29 = arith.constant 0 : index
    %c64 = arith.constant 64 : index
    %66 = vector.load %arg3[%c0_29, %c64] : memref<4x128xbf16, #tpu.memory_space<vmem>>, vector<4x32xbf16>
    %67 = arith.truncf %65 : vector<32x32xf32> to vector<32x32xbf16>
    %cst_30 = arith.constant dense<0.000000e+00> : vector<4x32xf32>
    %68 = tpu.matmul %66, %67, %cst_30 {dimension_numbers = #tpu.dot_dimension_numbers<[1], [1], [0], [0], [0, 0, 1, 0], [], []>} : vector<4x32xbf16>, vector<32x32xbf16>, vector<4x32xf32> -> vector<4x32xf32>
    %69 = arith.truncf %68 : vector<4x32xf32> to vector<4x32xbf16>
    %c224 = arith.constant 224 : index
    %c0_31 = arith.constant 0 : index
    %70 = vector.load %arg6[%c224, %c0_31] : memref<384x16xbf16, #tpu.memory_space<vmem>>, vector<32x16xbf16>
    %71 = arith.extf %70 : vector<32x16xbf16> to vector<32x16xf32>
    %c352 = arith.constant 352 : index
    %c0_32 = arith.constant 0 : index
    %72 = vector.load %arg6[%c352, %c0_32] : memref<384x16xbf16, #tpu.memory_space<vmem>>, vector<32x16xbf16>
    %cst_33 = arith.constant dense<0xFF800000> : vector<32xf32>
    %73 = vector.multi_reduction <maximumf>, %71, %cst_33 [1] : vector<32x16xf32> to vector<32xf32>
    %74 = vector.shape_cast %73 : vector<32xf32> to vector<32x1xf32>
    %75 = vector.broadcast %74 : vector<32x1xf32> to vector<32x16xf32>
    %76 = arith.subf %71, %75 : vector<32x16xf32>
    %77 = math.exp %76 : vector<32x16xf32>
    %cst_34 = arith.constant dense<0.000000e+00> : vector<32xf32>
    %78 = vector.multi_reduction <add>, %77, %cst_34 [1] : vector<32x16xf32> to vector<32xf32>
    %79 = vector.shape_cast %78 : vector<32xf32> to vector<32x1xf32>
    %80 = tpu.reciprocal %79 {approx = true} : vector<32x1xf32> -> vector<32x1xf32>
    %81 = arith.truncf %77 : vector<32x16xf32> to vector<32x16xbf16>
    %cst_35 = arith.constant dense<0.000000e+00> : vector<32x32xf32>
    %82 = tpu.matmul %81, %72, %cst_35 {dimension_numbers = #tpu.dot_dimension_numbers<[1], [1], [0], [0], [0, 0, 1, 0], [], []>} : vector<32x16xbf16>, vector<32x16xbf16>, vector<32x32xf32> -> vector<32x32xf32>
    %cst_36 = arith.constant 0.176776692 : f32
    %83 = vector.broadcast %cst_36 : f32 to vector<32x1xf32>
    %84 = arith.mulf %80, %83 : vector<32x1xf32>
    %85 = vector.broadcast %84 : vector<32x1xf32> to vector<32x32xf32>
    %86 = arith.mulf %82, %85 : vector<32x32xf32>
    %c0_37 = arith.constant 0 : index
    %c96 = arith.constant 96 : index
    %87 = vector.load %arg3[%c0_37, %c96] : memref<4x128xbf16, #tpu.memory_space<vmem>>, vector<4x32xbf16>
    %88 = arith.truncf %86 : vector<32x32xf32> to vector<32x32xbf16>
    %cst_38 = arith.constant dense<0.000000e+00> : vector<4x32xf32>
    %89 = tpu.matmul %87, %88, %cst_38 {dimension_numbers = #tpu.dot_dimension_numbers<[1], [1], [0], [0], [0, 0, 1, 0], [], []>} : vector<4x32xbf16>, vector<32x32xbf16>, vector<4x32xf32> -> vector<4x32xf32>
    %90 = arith.truncf %89 : vector<4x32xf32> to vector<4x32xbf16>
    %91 = tpu.concatenate %27, %48, %69, %90 in 1 : vector<4x32xbf16>, vector<4x32xbf16>, vector<4x32xbf16>, vector<4x32xbf16> -> vector<4x128xbf16>
    %c0_39 = arith.constant 0 : index
    %c0_40 = arith.constant 0 : index
    %92 = vector.load %arg6[%c0_39, %c0_40] : memref<384x16xbf16, #tpu.memory_space<vmem>>, vector<128x16xbf16>
    %cst_41 = arith.constant dense<0.000000e+00> : vector<4x16xf32>
    %93 = tpu.matmul %91, %92, %cst_41 {dimension_numbers = #tpu.dot_dimension_numbers<[1], [0], [0], [1], [0, 0, 1, 1], [], []>} : vector<4x128xbf16>, vector<128x16xbf16>, vector<4x16xf32> -> vector<4x16xf32>
    %c0_42 = arith.constant 0 : index
    %c0_43 = arith.constant 0 : index
    %94 = vector.load %arg4[%c0_42, %c0_43] : memref<4x1xf32, #tpu.memory_space<vmem>>, vector<4x1xf32>
    %95 = vector.broadcast %94 : vector<4x1xf32> to vector<4x16xf32>
    %96 = arith.addf %93, %95 : vector<4x16xf32>
    %97 = arith.truncf %96 : vector<4x16xf32> to vector<4x16xbf16>
    %c0_44 = arith.constant 0 : index
    %c0_45 = arith.constant 0 : index
    %c0_46 = arith.constant 0 : index
    %98 = vector.load %arg5[%c0_44, %c0_45, %c0_46] : memref<1x4x16xbf16, #tpu.memory_space<vmem>>, vector<1x4x16xbf16>
    %99 = vector.shape_cast %98 : vector<1x4x16xbf16> to vector<4x16xbf16>
    %100 = vector.shape_cast %97 : vector<4x16xbf16> to vector<1x4x16xbf16>
    tpu.vector_store %arg5[%c0_44, %c0_45, %c0_46], %100 {strides = array<i32>} : memref<1x4x16xbf16, #tpu.memory_space<vmem>>, vector<1x4x16xbf16>,
    return
  }
  func.func @transform_0(%arg0: i32) -> (i32, i32, i32) {
    %c0_i32 = arith.constant 0 : i32
    %c0_i32_0 = arith.constant 0 : i32
    %c0_i32_1 = arith.constant 0 : i32
    return %arg0, %c0_i32, %c0_i32_0 : i32, i32, i32
  }
  func.func @transform_1(%arg0: i32) -> (i32, i32) {
    %c0_i32 = arith.constant 0 : i32
    %c0_i32_0 = arith.constant 0 : i32
    %c0_i32_1 = arith.constant 0 : i32
    return %c0_i32, %c0_i32_0 : i32, i32
  }
  func.func @transform_2(%arg0: i32) -> (i32, i32) {
    %c0_i32 = arith.constant 0 : i32
    %c0_i32_0 = arith.constant 0 : i32
    %c0_i32_1 = arith.constant 0 : i32
    return %c0_i32, %c0_i32_0 : i32, i32
  }
  func.func @transform_3(%arg0: i32) -> (i32, i32) {
    %c0_i32 = arith.constant 0 : i32
    %c0_i32_0 = arith.constant 0 : i32
    %c0_i32_1 = arith.constant 0 : i32
    return %c0_i32, %c0_i32_0 : i32, i32
  }
  func.func @transform_4(%arg0: i32) -> (i32, i32, i32) {
    %c0_i32 = arith.constant 0 : i32
    %c0_i32_0 = arith.constant 0 : i32
    %c0_i32_1 = arith.constant 0 : i32
    return %arg0, %c0_i32, %c0_i32_0 : i32, i32, i32
  }
}

</mosaic_0001>

<bundles_post_ra>
// kernel: tpu_custom_call.1
= control target key start
LH: loop header
LB: loop body
LE: loop exit
PB: predicated region body
PF: predicated region fallthrough
CT: control target
= control target key end

     0   :  { %9 = vsyncpa [#allocation4], 0  ;;  %s2915_s0 = inlined_call_operand.hbm [shape: f32[2,4,16], index: 0, kind: input, shape index: {}]   ;;  %s2916_s1 = inlined_call_operand.hbm [shape: bf16[384,4], index: 1, kind: input, shape index: {}]   ;;  %s2917_s2 = inlined_call_operand.hbm [shape: bf16[4,128], index: 2, kind: input, shape index: {}]   ;;  %s2918_s3 = inlined_call_operand.hbm [shape: f32[4,1], index: 3, kind: input, shape index: {}]   ;;  %s2919_s4 = inlined_call_operand.hbm [shape: bf16[2,4,16], index: 4, kind: output, shape index: {}]  }
   0x1   :  { %11 = vsyncpa [#allocation4 + $0x1], 0 }
   0x2   :  { %12 = vsyncpa [#allocation7], 0 }
   0x3   :  { %13 = vsyncpa [#allocation10], 0 }
   0x4   :  { %14 = vsyncpa [#allocation5], 0 }
   0x5   :  { %16 = vsyncpa [#allocation5 + $0x1], 0  ;;  %s2375_s15 = smov 0   ;;  %s2377_s16 = smov 0  }
   0x6   :  { %s2379_s17 = smov 0   ;;  %s2381_s18 = smov 0  }
   0x7 LB: > { %s2396_s19 = sadd.s32 4294967295, %s2334_s18   ;;  %s1682_s20 = sadd.s32 4294967294, %s2334_s18   ;;  %s2334_s18 = sphi %s2381_s18, %s2942_s18   ;;  %s2330_s17 = sphi %s2379_s17, %s2941_s17   ;;  %s2326_s16 = sphi %s2377_s16, %s2940_s16   ;;  %s2322_s15 = sphi %s2375_s15, %s2939_s15  }
   0x8   : > { %p42_p0 = scmp.ne.s32.totalorder %s2326_s16, %s2322_s15  ;;  %p2920_p1 = scmp.eq.s32.totalorder %s2396_s19, 0 }
   0x9   : > { %p135_p3 = scmp.eq.s32.totalorder %s1682_s20, 1  ;;  %p1683_p5 = scmp.ge.s32.totalorder %s2334_s18, 1 }
   0xa   : > { %p2405_p4 = por %p2920_p1, %p42_p0  ;;  %p142_p7 = scmp.lt.s32.totalorder %s2334_s18, 3 }
   0xb   : > { %p2410_p6 = por %p135_p3, %p42_p0  ;;  %s2336_s24 = smov [#allocation6]  }
   0xc   : > { %s2923_s21 = scalar_select %p2405_p4, 1, 0 }
   0xd   : > { %s2924_s22 = scalar_select %p2410_p6, 1, 0 }
   0xe   : > { %p2415_p8 = pnand %p1683_p5, %p142_p7  ;;  %s154_s25 = sshll.u32 %s2336_s24, 4  ;;  %s2419_s25 = int_to_ptr.vmem [resolvable:$true] %s154_s25 }
   0xf   : > { %s2337_s27 = smov [#allocation8]   ;;  %s2338_s29 = smov [#allocation9]  }
  0x10   : > { %s2925_s23 = scalar_select %p2415_p8, 1, 0 }
  0x11   : > { %p1986_p9 = pneg %p2415_p8  ;;  %s168_s28 = sshll.u32 %s2337_s27, 4  ;;  %s2430_s28 = int_to_ptr.vmem [resolvable:$true] %s168_s28 }
  0x12   : > { %s2432_s30 = sshll.u32 %s2338_s29, 4  ;;  %s2146_s7 = scalar_lea.hbm %s2916_s1, 3072  ;;  %s180_s30 = int_to_ptr.vmem [resolvable:$true] %s2432_s30 }
  0x13   : > { %p2426_p11 = pnand %p1986_p9, %p2920_p1  ;;  %p2147_p12 = scmp.ne.s32.totalorder %s2916_s1, %s2146_s7 }
  0x14   : > { %p2153_p5 = scmp.lt.u32.totalorder %s2146_s7, %s2916_s1 }
  0x15   : > { %p2442_p13 = pneg %p2426_p11 }
  0x17   : > { %p2149_p0 = pnand %p2442_p13, %p2147_p12 }
  0x19   : > { %p2150_p3 = pneg %p2149_p0 }
  0x1b   : > { %p2155_p7 = pnand %p2153_p5, %p2150_p3 }
  0x1d   : > { %2158 = shalt.err (!%p2155_p7)
}
  0x1e   : > { %s2159_s13 = scalar_lea.vmem %s2419_s25, 3072  ;;  %p2167_p2 = scmp.lt.s32.totalorder %s2419_s25, %s2419_s25 }
  0x1f   : > { %p2160_p9 = scmp.ne.s32.totalorder %s2419_s25, %s2159_s13  ;;  %p2168_p6 = scmp.lt.s32.totalorder %s2159_s13, %s2159_s13 }
  0x21   : > { %p2162_p10 = pnand %p2160_p9, %p2442_p13  ;;  %p2169_p12 = por %p2168_p6, %p2167_p2 }
  0x23   : > { %p2163_p1 = pneg %p2162_p10 }
  0x25   : > { %p2170_p0 = pnand %p2169_p12, %p2163_p1 }
  0x27   : > { %2173 = shalt.err (!%p2170_p0)
}
  0x28   : > { %s2339_s14 = smov 64   ;;  %s2340_s20 = smov 4  }
  0x29   : > { %1989 = dma.hbm_to_vmem [thread:$0]  (!%p2426_p11), %s2916_s1, 3072, %s2419_s25, [#allocation7], %s2339_s14, %s2339_s14, %s2340_s20  }
  0x2a   : > { %s2174_s6 = scalar_lea.hbm %s2917_s2, 32 }
  0x2b   : > { %p2175_p2 = scmp.ne.s32.totalorder %s2917_s2, %s2174_s6  ;;  %p2181_p10 = scmp.lt.u32.totalorder %s2174_s6, %s2917_s2 }
  0x2d   : > { %p2177_p1 = pnand %p2175_p2, %p2442_p13 }
  0x2f   : > { %p2178_p6 = pneg %p2177_p1 }
  0x31   : > { %p2183_p3 = pnand %p2181_p10, %p2178_p6 }
  0x33   : > { %2186 = shalt.err (!%p2183_p3)
}
  0x34   : > { %s2187_s25 = scalar_lea.vmem %s2430_s28, 32  ;;  %p2195_p12 = scmp.lt.s32.totalorder %s2430_s28, %s2430_s28 }
  0x35   : > { %p2188_p5 = scmp.ne.s32.totalorder %s2430_s28, %s2187_s25  ;;  %p2196_p0 = scmp.lt.s32.totalorder %s2187_s25, %s2187_s25 }
  0x37   : > { %p2190_p7 = pnand %p2188_p5, %p2442_p13  ;;  %p2197_p2 = por %p2196_p0, %p2195_p12 }
  0x39   : > { %p2191_p9 = pneg %p2190_p7 }
  0x3b   : > { %p2198_p1 = pnand %p2197_p2, %p2191_p9 }
  0x3d   : > { %2201 = shalt.err (!%p2198_p1)
}
  0x3e   : > { %1992 = dma.hbm_to_vmem [thread:$0]  (!%p2426_p11), %s2917_s2, 32, %s2430_s28, [#allocation7]  }
  0x3f   : > { %s2202_s24 = scalar_lea.hbm %s2918_s3, 64 }
  0x40   : > { %p2203_p6 = scmp.ne.s32.totalorder %s2918_s3, %s2202_s24  ;;  %p2209_p5 = scmp.lt.u32.totalorder %s2202_s24, %s2918_s3 }
  0x42   : > { %p2205_p10 = pnand %p2203_p6, %p2442_p13 }
  0x44   : > { %p2206_p3 = pneg %p2205_p10 }
  0x46   : > { %p2211_p7 = pnand %p2209_p5, %p2206_p3 }
  0x48   : > { %2214 = shalt.err (!%p2211_p7)
}
  0x49   : > { %s2215_s7 = scalar_lea.vmem %s180_s30, 64  ;;  %p2223_p2 = scmp.lt.s32.totalorder %s180_s30, %s180_s30 }
  0x4a   : > { %p2216_p9 = scmp.ne.s32.totalorder %s180_s30, %s2215_s7  ;;  %p2224_p1 = scmp.lt.s32.totalorder %s2215_s7, %s2215_s7 }
  0x4c   : > { %p2218_p12 = pnand %p2216_p9, %p2442_p13  ;;  %p2225_p4 = por %p2224_p1, %p2223_p2 }
  0x4e   : > { %p2219_p0 = pneg %p2218_p12 }
  0x50   : > { %p2226_p8 = pnand %p2225_p4, %p2219_p0 }
  0x52   : > { %2229 = shalt.err (!%p2226_p8)
}
  0x53   : > { %1995 = dma.hbm_to_vmem [thread:$0]  (!%p2426_p11), %s2918_s3, 64, %s180_s30, [#allocation10]  }
  0x54   : > { %s2506_s10 = sadd.s32 1, %s2334_s18   ;;  %s29_s26 = sadd.s32 1, %s2330_s17 }
  0x55   : > { %s26_s9 = ssub.s32 %s2334_s18, %s2506_s10  ;;  %p36_p8 = scmp.ne.s32.totalorder %s2330_s17, %s2326_s16 }
  0x56   : > { %p27_p4 = scmp.eq.s32.totalorder %s26_s9, 0  ;;  %p37_p13 = scmp.eq.s32.totalorder %s2334_s18, 0 }
  0x57   : > { %p2007_p6 = scmp.lt.s32.totalorder %s2334_s18, 2  ;;  %p2928_p3 = scmp.eq.s32.totalorder %s2396_s19, 1 }
  0x58   : > { %s2516_s11 = scalar_select %p27_p4, %s2330_s17, %s29_s26  }
  0x59   : > { %p38_p10 = por %p37_p13, %p36_p8  ;;  %p2520_p5 = por %p2928_p3, %p36_p8 }
  0x5a   : > { %s190_s12 = sand.u32 1, %s2330_s17   ;;  %s1689_s13 = sshll.u32 %s2334_s18, 6 }
  0x5b   : > { %s1688_s30 = sshll.u32 %s190_s12, 2  ;;  %s2529_s24 = scalar_lea.hbm %s2915_s0, %s1689_s13 }
  0x5c   : > { %s194_s27 = scalar_lea.vmem [#allocation3], %s1688_s30  ;;  %p2531_p11 = pnand %p2007_p6, %p38_p10 }
  0x5d   : > { %s201_s29 = sshll.u32 %s194_s27, 4  ;;  %s191_s6 = scalar_lea.sflag [#allocation4], %s190_s12  ;;  %s2535_s29 = int_to_ptr.vmem [resolvable:$true] %s201_s29 }
  0x5e   : > { %s2230_s7 = scalar_lea.hbm %s2529_s24, 64  ;;  %p2232_p9 = pneg %p2531_p11 }
  0x5f   : > { %p2231_p7 = scmp.ne.s32.totalorder %s2529_s24, %s2230_s7  ;;  %s2235_s9 = scalar_lea.hbm %s2915_s0, 128 }
  0x60   : > { %p2236_p2 = scmp.lt.u32.totalorder %s2529_s24, %s2915_s0  ;;  %p2237_p1 = scmp.lt.u32.totalorder %s2235_s9, %s2230_s7 }
  0x61   : > { %p2233_p12 = pnand %p2232_p9, %p2231_p7  ;;  %p2239_p8 = scmp.lt.u32.totalorder %s2230_s7, %s2529_s24 }
  0x62   : > { %p2238_p4 = por %p2237_p1, %p2236_p2 }
  0x63   : > { %p2234_p0 = pneg %p2233_p12 }
  0x64   : > { %p2240_p13 = por %p2239_p8, %p2238_p4 }
  0x66   : > { %p2241_p6 = pnand %p2240_p13, %p2234_p0 }
  0x68   : > { %2244 = shalt.err (!%p2241_p6)
}
  0x69   : > { %s2245_s12 = scalar_lea.vmem %s2535_s29, 64  ;;  %s2341_s30 = smov [#allocation3]  }
  0x6a   : > { %p2246_p10 = scmp.ne.s32.totalorder %s2535_s29, %s2245_s12  ;;  %s2250_s14 = sshll.u32 %s2341_s30, 4  ;;  %s2251_s14 = int_to_ptr.vmem [resolvable:$false] %s2250_s14 }
  0x6b   : > { %s2252_s20 = scalar_lea.vmem %s2251_s14, 128  ;;  %p2253_p12 = scmp.lt.s32.totalorder %s2535_s29, %s2251_s14 }
  0x6c   : > { %p2248_p3 = pnand %p2246_p10, %p2232_p9  ;;  %p2254_p2 = scmp.lt.s32.totalorder %s2252_s20, %s2245_s12 }
  0x6e   : > { %p2249_p7 = pneg %p2248_p3  ;;  %p2255_p1 = por %p2254_p2, %p2253_p12 }
  0x70   : > { %p2256_p4 = pnand %p2255_p1, %p2249_p7 }
  0x72   : > { %2259 = shalt.err (!%p2256_p4)
}
  0x73   : > { %1999 = dma.hbm_to_vmem [thread:$0]  (!%p2531_p11), %s2529_s24, 64, %s2535_s29, %s191_s6  }
  0x74   : > { %p2931_p0 = scmp.ne.s32.totalorder %s2925_s23, 0 }
  0x75   : > { %s2565_s27 = sand.u32 (!%p2931_p0), 1, %s2326_s16   ;;  %p2932_p9 = scmp.ne.s32.totalorder (!%p2931_p0), %s2923_s21, 0 }
  0x76   : > { %210 = sbr.rel (%p2931_p0) target bundleno = 1876 (0x754), region = 36  ;;  %s1691_s7 = sshll.u32 (!%p2931_p0), %s2565_s27, 2 }
  0x77   : > { %s213_s28 = scalar_lea.sflag (!%p2931_p0), [#allocation4], %s2565_s27  ;;  %s216_s8 = scalar_lea.vmem (!%p2931_p0), [#allocation3], %s1691_s7 }
  0x7d   : > { %2305 = dma.done.wait (%p2932_p9), %s213_s28, 64  }
  0x7e   : > { %2307 = vsyncadd (%p2932_p9), %s213_s28, 4294967232  ;;  %p2933_p8 = scmp.eq.s32.totalorder %s2396_s19, 0 }
  0x80   : > { %2309 = dma.done.wait (%p2933_p8), [#allocation7], 3104   ;;  %p2934_p11 = pmov %p2933_p8 }
  0x81   : > { %p2935_p13 = pmov %p2933_p8 }
  0x82   : > { %2311 = vsyncadd (%p2934_p11), [#allocation7], 4294964192 }
  0x83   : > { %2313 = dma.done.wait (%p2935_p13), [#allocation10], 64   ;;  %p2936_p6 = pmov %p2933_p8 }
  0x84   : > { %vm497_vm0 = vcmask 1041408   ;;  %vm424_vm1 = vcmask 31744   ;;  %v254_v0 = vld [vmem:[%s216_s8] sm:$0xf]  ;;  %v2058_v2 = vld [vmem:[#allocation6] sm:$0xff]   ;;  %v2059_v4 = vld [vmem:[#allocation6 + $0x8] sm:$0xff]  }
  0x85   : > { %2315 = vsyncadd (%p2936_p6), [#allocation10], 4294967232  ;;  %v255_v1 = vpack.c.bf16 %v254_v0, %v254_v0  ;;  %1826 = vmatprep.mubr.msk.bf16.mxu0 %vm424_vm1, %v2058_v2  ;;  %v2060_v5 = vld [vmem:[#allocation6 + $0x10] sm:$0xff]   ;;  %v2061_v6 = vld [vmem:[#allocation6 + $0x18] sm:$0xff]   ;;  %vm750_vm2 = vcmask 130048   ;;  %vm2343_vm3 = vmmov 0  }
  0x86   : > { %v2062_v7 = vld [vmem:[#allocation6 + $0x20] sm:$0xff]   ;;  %v2063_v8 = vld [vmem:[#allocation6 + $0x28] sm:$0xff]   ;;  %v2064_v9 = vld [vmem:[#allocation6 + $0x30] sm:$0xff]   ;;  %s2345_s21 = smov 96   ;;  %vm897_vm4 = vcmask 261120   ;;  %s2346_s23 = smov 64  }
  0x87   : > { %1960 = vmatprep.subr.msk.bf16.mxu0 %vm497_vm0, %v255_v1  ;;  %v499_v3 = vsel %vm497_vm0, %v255_v1, 0  ;;  %1961 = vmatprep.subr.msk.bf16.mxu1 %vm497_vm0, %v255_v1  ;;  %v2065_v10 = vld [vmem:[#allocation6 + $0x38] sm:$0xff]   ;;  %v2066_v11 = vld [vmem:[#allocation6 + $0x40] sm:$0xff]   ;;  %v2067_v12 = vld [vmem:[#allocation6 + $0x48] sm:$0xff]   ;;  %s2347_s24 = smov 32   ;;  %vm1505_vm5 = vcmask 523264  }
  0x88   : > { %1825 = vmatpush3.bf16.msra.mxu0 %v499_v3  ;;  %1959 = vmatpush3.bf16.msra.mxu1 %v499_v3  ;;  %v2068_v13 = vld [vmem:[#allocation6 + $0x50] sm:$0xff]   ;;  %v2069_v14 = vld [vmem:[#allocation6 + $0x58] sm:$0xff]   ;;  %v2070_v15 = vld [vmem:[#allocation6 + $0x60] sm:$0xff]   ;;  %vm1508_vm6 = vcmask 785408   ;;  %s1695_s29 = sshll.u32 %s2565_s27, 1  ;;  %s1759_s5 = sshll.u32 %s2396_s19, 5 }
  0x89   : > { %v2071_v16 = vld [vmem:[#allocation6 + $0x68] sm:$0xff]   ;;  %v2072_v17 = vld [vmem:[#allocation6 + $0x70] sm:$0xff]   ;;  %v2073_v18 = vld [vmem:[#allocation6 + $0x78] sm:$0xff]   ;;  %s252_s6 = scalar_lea.vmem [#allocation11], %s1695_s29  ;;  %vm1567_vm7 = vcmask 123904   ;;  %s2871_s12 = scalar_lea.hbm %s2919_s4, %s1759_s5 }
  0x8a   : > { %v2074_v19 = vld [vmem:[#allocation6 + $0x80] sm:$0xff]   ;;  %v2075_v20 = vld [vmem:[#allocation6 + $0x88] sm:$0xff]   ;;  %s1583_s9 = sshll.u32 %s252_s6, 4  ;;  %s1570_s19 = scalar_lea.sflag [#allocation5], %s2565_s27  ;;  %s2873_s9 = int_to_ptr.vmem [resolvable:$true] %s1583_s9 }
  0x8b   : > { %1827 = vmatmul.mubr.msk.bf16.vlgmr.msra.gmra.mrb[0].mxu0 %vm424_vm1, %v2059_v4  ;;  %v2076_v21 = vld [vmem:[#allocation6 + $0xa0] sm:$0xff]   ;;  %v2077_v22 = vld [vmem:[#allocation6 + $0xa8] sm:$0xff]   ;;  %s2260_s30 = scalar_lea.vmem %s2873_s9, 32  ;;  %s2349_s14 = smov [#allocation11]  }
  0x8c   : > { %1830 = vmatprep.mubr.msk.bf16.mxu0 %vm424_vm1, %v2060_v5  ;;  %1866 = vmatprep.mubr.msk.bf16.mxu1 %vm424_vm1, %v2076_v21  ;;  %p2261_p10 = scmp.ne.s32.totalorder %s2873_s9, %s2260_s30  ;;  %s2264_s20 = sshll.u32 %s2349_s14, 4  ;;  %s2265_s20 = int_to_ptr.vmem [resolvable:$false] %s2264_s20 }
  0x8d   : > { %1867 = vmatmul.mubr.msk.bf16.vlgmr.msra.gmra.mrb[0].mxu1 %vm424_vm1, %v2077_v22  ;;  %s2266_s7 = scalar_lea.vmem %s2265_s20, 64  ;;  %p2267_p12 = scmp.lt.s32.totalorder %s2873_s9, %s2265_s20 }
  0x8e   : > { %p2262_p3 = pnand %p2261_p10, %p2520_p5  ;;  %p2268_p2 = scmp.lt.s32.totalorder %s2266_s7, %s2260_s30 }
  0x90   : > { %p2263_p7 = pneg %p2262_p3  ;;  %p2269_p1 = por %p2268_p2, %p2267_p12 }
  0x92   : > { %p2270_p4 = pnand %p2269_p1, %p2263_p7 }
  0x93   : > { %1831 = vmatmul.mubr.msk.bf16.gmra.mrb[4].mxu0 %vm424_vm1, %v2061_v6 }
  0x94   : > { %1834 = vmatprep.mubr.msk.bf16.mxu0 %vm424_vm1, %v2062_v7 }
  0x9b   : > { %1835 = vmatmul.mubr.msk.bf16.gmra.mrb[8].mxu0 %vm424_vm1, %v2063_v8 }
  0x9c   : > { %1838 = vmatprep.mubr.msk.bf16.mxu0 %vm424_vm1, %v2064_v9 }
  0xa3   : > { %1839 = vmatmul.mubr.msk.bf16.gmra.mrb[12].mxu0 %vm424_vm1, %v2065_v10 }
  0xa4   : > { %1842 = vmatprep.mubr.msk.bf16.mxu0 %vm424_vm1, %v2066_v11 }
  0xab   : > { %1843 = vmatmul.mubr.msk.bf16.gmra.mrb[16].mxu0 %vm424_vm1, %v2067_v12 }
  0xac   : > { %1846 = vmatprep.mubr.msk.bf16.mxu0 %vm424_vm1, %v2068_v13 }
  0xb3   : > { %1847 = vmatmul.mubr.msk.bf16.gmra.mrb[20].mxu0 %vm424_vm1, %v2069_v14 }
  0xb4   : > { %1850 = vmatprep.mubr.msk.bf16.mxu0 %vm424_vm1, %v2070_v15 }
  0xbb   : > { %1851 = vmatmul.mubr.msk.bf16.gmra.mrb[24].mxu0 %vm424_vm1, %v2071_v16 }
  0xbc   : > { %1854 = vmatprep.mubr.msk.bf16.mxu0 %vm424_vm1, %v2072_v17  ;;  %v2078_v17 = vld [vmem:[#allocation6 + $0xb0] sm:$0xff]  }
  0xbd   : > { %1870 = vmatprep.mubr.msk.bf16.mxu1 %vm424_vm1, %v2078_v17 }
  0xc3   : > { %1855 = vmatmul.mubr.msk.bf16.gmra.mrb[28].mxu0 %vm424_vm1, %v2073_v18 }
  0xc4   : > { %1858 = vmatprep.mubr.msk.bf16.mxu0 %vm424_vm1, %v2074_v19  ;;  %v2079_v19 = vld [vmem:[#allocation6 + $0xb8] sm:$0xff]  }
  0xc5   : > { %1871 = vmatmul.mubr.msk.bf16.gmra.mrb[4].mxu1 %vm424_vm1, %v2079_v19 }
  0xcb   : > { %1859 = vmatmul.mubr.msk.bf16.gmra.mrb[32].mxu0 %vm424_vm1, %v2075_v20 }
 0x15e   : > { %v1828_v23 = vpop.f32.mrb[0].mxu0 }
 0x15f   : > { %v535_v24 = vpop.f32.mrb[1].mxu0 }
 0x160   : > { %v1829_v25 = vpop.f32.mrb[2].mxu0 }
 0x161   : > { %v727_v26 = vpack.c.bf16 %v1829_v25, %v1828_v23  ;;  %v538_v27 = vpop.f32.mrb[3].mxu0 }
 0x162   : > { %v726_v28 = vpack.c.bf16 %v538_v27, %v535_v24 }
 0x163   : > { %752 = vst.msk [vmem:[#allocation2 + $0x8] sm:$0xff] %vm750_vm2, %v727_v26 }
 0x164   : > { %751 = vst.msk [vmem:[#allocation2] sm:$0xff] %vm750_vm2, %v726_v28 }
 0x166   : > { %v1832_v29 = vpop.f32.mrb[4].mxu0 }
 0x167   : > { %v551_v30 = vpop.f32.mrb[5].mxu0 }
 0x168   : > { %v1833_v31 = vpop.f32.mrb[6].mxu0 }
 0x169   : > { %v729_v32 = vpack.c.bf16 %v1833_v31, %v1832_v29  ;;  %v554_v33 = vpop.f32.mrb[7].mxu0  ;;  %v2080_v29 = vld [vmem:[#allocation6 + $0x90] sm:$0xff]  }
 0x16a   : > { %v728_v34 = vpack.c.bf16 %v554_v33, %v551_v30  ;;  %1862 = vmatprep.mubr.msk.bf16.mxu0 %vm424_vm1, %v2080_v29  ;;  %v2081_v30 = vld [vmem:[#allocation6 + $0x98] sm:$0xff]  }
 0x16b   : > { %754 = vst.msk [vmem:[#allocation2 + $0x18] sm:$0xff] %vm750_vm2, %v729_v32  ;;  %1863 = vmatmul.mubr.msk.bf16.gmra.mrb[36].mxu0 %vm424_vm1, %v2081_v30 }
 0x16c   : > { %753 = vst.msk [vmem:[#allocation2 + $0x10] sm:$0xff] %vm750_vm2, %v728_v34 }
 0x16e   : > { %v1836_v35 = vpop.f32.mrb[8].mxu0 }
 0x16f   : > { %v567_v36 = vpop.f32.mrb[9].mxu0 }
 0x170   : > { %v1837_v37 = vpop.f32.mrb[10].mxu0 }
 0x171   : > { %v731_v38 = vpack.c.bf16 %v1837_v37, %v1836_v35  ;;  %v570_v39 = vpop.f32.mrb[11].mxu0 }
 0x172   : > { %v730_v40 = vpack.c.bf16 %v570_v39, %v567_v36 }
 0x173   : > { %756 = vst.msk [vmem:[#allocation2 + $0x28] sm:$0xff] %vm750_vm2, %v731_v38 }
 0x174   : > { %755 = vst.msk [vmem:[#allocation2 + $0x20] sm:$0xff] %vm750_vm2, %v730_v40 }
 0x176   : > { %v1840_v41 = vpop.f32.mrb[12].mxu0 }
 0x177   : > { %v583_v42 = vpop.f32.mrb[13].mxu0 }
 0x178   : > { %v1841_v43 = vpop.f32.mrb[14].mxu0 }
 0x179   : > { %v733_v44 = vpack.c.bf16 %v1841_v43, %v1840_v41  ;;  %v586_v45 = vpop.f32.mrb[15].mxu0 }
 0x17a   : > { %v732_v46 = vpack.c.bf16 %v586_v45, %v583_v42 }
 0x17b   : > { %758 = vst.msk [vmem:[#allocation2 + $0x38] sm:$0xff] %vm750_vm2, %v733_v44 }
 0x17c   : > { %757 = vst.msk [vmem:[#allocation2 + $0x30] sm:$0xff] %vm750_vm2, %v732_v46 }
 0x17e   : > { %v1844_v47 = vpop.f32.mrb[16].mxu0 }
 0x17f   : > { %v599_v48 = vpop.f32.mrb[17].mxu0 }
 0x180   : > { %v1845_v49 = vpop.f32.mrb[18].mxu0 }
 0x181   : > { %v735_v50 = vpack.c.bf16 %v1845_v49, %v1844_v47  ;;  %v602_v51 = vpop.f32.mrb[19].mxu0 }
 0x182   : > { %v734_v52 = vpack.c.bf16 %v602_v51, %v599_v48 }
 0x183   : > { %760 = vst.msk [vmem:[#allocation2 + $0x48] sm:$0xff] %vm750_vm2, %v735_v50 }
 0x184   : > { %759 = vst.msk [vmem:[#allocation2 + $0x40] sm:$0xff] %vm750_vm2, %v734_v52 }
 0x186   : > { %v1848_v53 = vpop.f32.mrb[20].mxu0 }
 0x187   : > { %v615_v54 = vpop.f32.mrb[21].mxu0 }
 0x188   : > { %v1849_v55 = vpop.f32.mrb[22].mxu0 }
 0x189   : > { %v737_v56 = vpack.c.bf16 %v1849_v55, %v1848_v53  ;;  %v618_v57 = vpop.f32.mrb[23].mxu0 }
 0x18a   : > { %v2611_v58 = vld [vmem:[#allocation2 + $0x48] sm:$0xff]  ;;  %v736_v59 = vpack.c.bf16 %v618_v57, %v615_v54 }
 0x18b   : > { %v779_v60 = vunpack.c.l.bf16 %v2611_v58  ;;  %v2614_v61 = vld [vmem:[#allocation2 + $0x40] sm:$0xff]  ;;  %762 = vst.msk [vmem:[#allocation2 + $0x58] sm:$0xff] %vm750_vm2, %v737_v56  ;;  %v780_v0 = vunpack.c.h.bf16 %v2611_v58 }
 0x18c   : > { %v777_v62 = vunpack.c.l.bf16 %v2614_v61  ;;  %761 = vst.msk [vmem:[#allocation2 + $0x50] sm:$0xff] %vm750_vm2, %v736_v59  ;;  %v778_v2 = vunpack.c.h.bf16 %v2614_v61 }
 0x18d   : > { %v789_v63 = vsel %vm750_vm2, %v779_v60, -inf  ;;  %v792_v6 = vsel %vm750_vm2, %v780_v0, -inf }
 0x18e   : > { %790 = vmax.xlane.f32.xlu1 %v789_v63  ;;  %v783_v1 = vsel %vm750_vm2, %v777_v62, -inf  ;;  %v1852_v3 = vpop.f32.mrb[24].mxu0  ;;  %v786_v9 = vsel %vm750_vm2, %v778_v2, -inf  ;;  %v1868_v63 = vpop.f32.mrb[0].mxu1 }
 0x18f   : > { %784 = vmax.xlane.f32.xlu0 %v783_v1  ;;  %v631_v4 = vpop.f32.mrb[25].mxu0 }
 0x190   : > { %v1853_v5 = vpop.f32.mrb[26].mxu0 }
 0x191   : > { %v739_v7 = vpack.c.bf16 %v1853_v5, %v1852_v3  ;;  %v634_v8 = vpop.f32.mrb[27].mxu0 }
 0x192   : > { %793 = vmax.xlane.f32.xlu1 %v792_v6  ;;  %v738_v10 = vpack.c.bf16 %v634_v8, %v631_v4  ;;  %v2645_v54 = vld [vmem:[#allocation2 + $0x58] sm:$0xff] }
 0x193   : > { %787 = vmax.xlane.f32.xlu0 %v786_v9  ;;  %764 = vst.msk [vmem:[#allocation2 + $0x68] sm:$0xff] %vm750_vm2, %v739_v7  ;;  %v2640_v46 = vld [vmem:[#allocation2 + $0x50] sm:$0xff]  ;;  %v952_v58 = vunpack.c.l.bf16 %v2645_v54  ;;  %v953_v61 = vunpack.c.h.bf16 %v2645_v54 }
 0x194   : > { %763 = vst.msk [vmem:[#allocation2 + $0x60] sm:$0xff] %vm750_vm2, %v738_v10  ;;  %v950_v52 = vunpack.c.l.bf16 %v2640_v46  ;;  %v951_v57 = vunpack.c.h.bf16 %v2640_v46 }
 0x196   : > { %v1856_v11 = vpop.f32.mrb[28].mxu0  ;;  %v956_v56 = vsel %vm750_vm2, %v950_v52, -inf  ;;  %v959_v59 = vsel %vm750_vm2, %v951_v57, -inf }
 0x197   : > { %v647_v12 = vpop.f32.mrb[29].mxu0 }
 0x198   : > { %v1857_v13 = vpop.f32.mrb[30].mxu0 }
 0x199   : > { %v741_v14 = vpack.c.bf16 %v1857_v13, %v1856_v11  ;;  %v650_v15 = vpop.f32.mrb[31].mxu0 }
 0x19a   : > { %v740_v16 = vpack.c.bf16 %v650_v15, %v647_v12 }
 0x19b   : > { %766 = vst.msk [vmem:[#allocation2 + $0x78] sm:$0xff] %vm750_vm2, %v741_v14 }
 0x19c   : > { %765 = vst.msk [vmem:[#allocation2 + $0x70] sm:$0xff] %vm750_vm2, %v740_v16  ;;  %v2342_v16 = vmov 0.0  }
 0x19e   : > { %v1860_v18 = vpop.f32.mrb[32].mxu0 }
 0x19f   : > { %v663_v20 = vpop.f32.mrb[33].mxu0 }
 0x1a0   : > { %v1861_v21 = vpop.f32.mrb[34].mxu0 }
 0x1a1   : > { %v743_v22 = vpack.c.bf16 %v1861_v21, %v1860_v18  ;;  %v666_v23 = vpop.f32.mrb[35].mxu0 }
 0x1a2   : > { %v742_v24 = vpack.c.bf16 %v666_v23, %v663_v20 }
 0x1a3   : > { %768 = vst.msk [vmem:[#allocation2 + $0x88] sm:$0xff] %vm750_vm2, %v743_v22  ;;  %v2709_v54 = vld [vmem:[#allocation2 + $0x70] sm:$0xff] }
 0x1a4   : > { %767 = vst.msk [vmem:[#allocation2 + $0x80] sm:$0xff] %vm750_vm2, %v742_v24 }
 0x1aa   : > { %v782_v26 = vld [vmem:[#allocation2 + $0x88] sm:$0xff] }
 0x1ab   : > { %v781_v25 = vld [vmem:[#allocation2 + $0x80] sm:$0xff]  ;;  %v835_v28 = vsel %vm750_vm2, %v782_v26, 0 }
 0x1ac   : > { %1962 = vmatprep.subr.msk.bf16.mxu1 %vm750_vm2, %v781_v25  ;;  %v832_v27 = vsel %vm750_vm2, %v781_v25, 0 }
 0x1ad   : > { %1875 = vmatpush3.bf16.xpose.msra.mxu1 %v832_v27 }
 0x1ae   : > { %1963 = vmatprep.subr.msk.bf16.mxu1 %vm750_vm2, %v782_v26 }
 0x1b5   : > { %1877 = vmatpush3.bf16.xpose.msra.mxu1 %v835_v28 }
 0x1b6   : > { %1882 = vmatprep.subr.bf16.mxu1 %v2342_v16 }
 0x21b   : > { %v791_v31 = vpop.xlane.xlu1 %790 }
 0x21c   : > { %v797_v32 = vsub.f32 %v779_v60, %v791_v31  ;;  %v785_v33 = vpop.xlane.xlu0 %784  ;;  %v962_v60 = vsel %vm750_vm2, %v952_v58, -inf }
 0x21d   : > { %v795_v34 = vsub.f32 %v777_v62, %v785_v33  ;;  %v965_v62 = vsel %vm750_vm2, %v953_v61, -inf }
 0x21e   : > { %v803_v35 = vmul.f32 1.442695, %v797_v32 }
 0x21f   : > { %v799_v36 = vmul.f32 1.442695, %v795_v34  ;;  %v794_v37 = vpop.xlane.xlu1 %793 }
 0x220   : > { %v798_v38 = vsub.f32 %v780_v0, %v794_v37  ;;  %v788_v39 = vpop.xlane.xlu0 %787  ;;  %v695_v0 = vpop.f32.mrb[1].mxu1 }
 0x221   : > { %2082 = vpow2.f32 %v799_v36  ;;  %v796_v40 = vsub.f32 %v778_v2, %v788_v39  ;;  %v1869_v1 = vpop.f32.mrb[2].mxu1 }
 0x222   : > { %v805_v41 = vmul.f32 1.442695, %v798_v38  ;;  %2084 = vpow2.f32 %v803_v35  ;;  %v747_v2 = vpack.c.bf16 %v1869_v1, %v1868_v63  ;;  %v698_v3 = vpop.f32.mrb[3].mxu1 }
 0x223   : > { %v801_v42 = vmul.f32 1.442695, %v796_v40  ;;  %v746_v4 = vpack.c.bf16 %v698_v3, %v695_v0  ;;  %v1872_v5 = vpop.f32.mrb[4].mxu1  ;;  %v2683_v40 = vld [vmem:[#allocation2 + $0x60] sm:$0xff]  ;;  %v2344_v3 = vmov 1983009808  }
 0x224   : > { %2086 = vpow2.f32 %v805_v41  ;;  %772 = vst.msk [vmem:[#allocation2 + $0xa8] sm:$0xff] %vm750_vm2, %v747_v2  ;;  %v711_v6 = vpop.f32.mrb[5].mxu1  ;;  %v1131_v46 = vunpack.c.l.bf16 %v2683_v40 }
 0x225   : > { %2088 = vpow2.f32 %v801_v42  ;;  %771 = vst.msk [vmem:[#allocation2 + $0xa0] sm:$0xff] %vm750_vm2, %v746_v4  ;;  %v1873_v7 = vpop.f32.mrb[6].mxu1  ;;  %v1071_v4 = vunpack.c.l.s4 %v2344_v3 }
 0x226   : > { %v749_v8 = vpack.c.bf16 %v1873_v7, %v1872_v5  ;;  %v714_v9 = vpop.f32.mrb[7].mxu1  ;;  %v1073_v5 = vlaneseq }
 0x227   : > { %v748_v10 = vpack.c.bf16 %v714_v9, %v711_v6  ;;  %v1072_v7 = vunpack.c.0.s8 %v1071_v4 }
 0x228   : > { %774 = vst.msk [vmem:[#allocation2 + $0xb8] sm:$0xff] %vm750_vm2, %v749_v8  ;;  %v1074_v8 = vshrl.u32 %v1073_v5, 7 }
 0x229   : > { %773 = vst.msk [vmem:[#allocation2 + $0xb0] sm:$0xff] %vm750_vm2, %v748_v10  ;;  %v894_v10 = vld [vmem:[#allocation8] sm:$0x3] }
 0x22a   : > { %v1075_v9 = vsub.s32 %v1072_v7, %v1074_v8 }
 0x22b   : > { %v2083_v43 = vpop.eup %2082 }
 0x22c   : > { %v807_v44 = vsel %vm750_vm2, %v2083_v43, 0.0  ;;  %v2085_v45 = vpop.eup %2084 }
 0x22d   : > { %808 = vadd.xlane.f32.xlu0 %v807_v44  ;;  %v813_v49 = vsel %vm750_vm2, %v2085_v45, 0.0 }
 0x22e   : > { %v2087_v47 = vpop.eup %2086 }
 0x22f   : > { %v2089_v48 = vpop.eup %2088  ;;  %v824_v53 = vpack.c.bf16 %v2087_v47, %v2085_v45  ;;  %v816_v55 = vsel %vm750_vm2, %v2087_v47, 0.0  ;;  %v1318_v13 = vld [vmem:[#allocation2 + $0xb8] sm:$0xff]  ;;  %v2696_v47 = vld [vmem:[#allocation2 + $0x68] sm:$0xff] }
 0x230   : > { %v810_v50 = vsel %vm750_vm2, %v2089_v48, 0.0  ;;  %v823_v51 = vpack.c.bf16 %v2089_v48, %v2083_v43  ;;  %v1317_v11 = vld [vmem:[#allocation2 + $0xb0] sm:$0xff]  ;;  %v1371_v14 = vsel %vm750_vm2, %v1318_v13, 0 }
 0x231   : > { %814 = vadd.xlane.f32.xlu0 %v813_v49  ;;  %811 = vadd.xlane.f32.xlu1 %v810_v50  ;;  %v1368_v12 = vsel %vm750_vm2, %v1317_v11, 0  ;;  %v1132_v50 = vunpack.c.h.bf16 %v2683_v40 }
 0x232   : > { %1878 = vmatprep.mubr.msk.bf16.mxu1 %vm750_vm2, %v823_v51  ;;  %1968 = vmatprep.subr.msk.bf16.mxu0 %vm750_vm2, %v1317_v11  ;;  %v1076_v11 = vrot.slane %v894_v10, %v1075_v9 }
 0x233   : > { %1879 = vmatmul.mubr.msk.bf16.vlgmr.msra.gmra.mrb[8].mxu1 %vm750_vm2, %v824_v53  ;;  %1923 = vmatpush3.bf16.xpose.msra.mxu0 %v1368_v12  ;;  %v1133_v53 = vunpack.c.l.bf16 %v2696_v47 }
 0x234   : > { %1969 = vmatprep.subr.msk.bf16.mxu0 %vm750_vm2, %v1318_v13  ;;  %1886 = vmatprep.mubr.msk.bf16.mxu1 %vm2343_vm3, %v2342_v16 }
 0x235   : > { %817 = vadd.xlane.f32.xlu1 %v816_v55  ;;  %957 = vmax.xlane.f32.xlu0 %v956_v56  ;;  %v1140_v55 = vsel %vm750_vm2, %v1132_v50, -inf  ;;  %v1134_v56 = vunpack.c.h.bf16 %v2696_v47 }
 0x239   : > { %960 = vmax.xlane.f32.xlu1 %v959_v59  ;;  %963 = vmax.xlane.f32.xlu0 %v962_v60  ;;  %v1146_v59 = vsel %vm750_vm2, %v1134_v56, -inf  ;;  %v1314_v60 = vunpack.c.h.bf16 %v2709_v54 }
 0x23b   : > { %1925 = vmatpush3.bf16.xpose.msra.mxu0 %v1371_v14  ;;  %v1322_v63 = vsel %vm750_vm2, %v1314_v60, -inf }
 0x23c   : > { %1938 = vmatprep.subr.bf16.mxu0 %v2342_v16 }
 0x23d   : > { %966 = vmax.xlane.f32.xlu1 %v965_v62  ;;  %v2726_v62 = vld [vmem:[#allocation2 + $0x78] sm:$0xff] }
 0x23e   : > { %v1864_v15 = vpop.f32.mrb[36].mxu0  ;;  %v1315_v0 = vunpack.c.l.bf16 %v2726_v62  ;;  %v1316_v2 = vunpack.c.h.bf16 %v2726_v62 }
 0x23f   : > { %v679_v17 = vpop.f32.mrb[37].mxu0 }
 0x240   : > { %v1865_v18 = vpop.f32.mrb[38].mxu0  ;;  %v1325_v1 = vsel %vm750_vm2, %v1315_v0, -inf  ;;  %v1328_v6 = vsel %vm750_vm2, %v1316_v2, -inf }
 0x241   : > { %v745_v19 = vpack.c.bf16 %v1865_v18, %v1864_v15  ;;  %v682_v20 = vpop.f32.mrb[39].mxu0 }
 0x242   : > { %v744_v21 = vpack.c.bf16 %v682_v20, %v679_v17 }
 0x243   : > { %770 = vst.msk [vmem:[#allocation2 + $0x98] sm:$0xff] %vm750_vm2, %v745_v19 }
 0x244   : > { %769 = vst.msk [vmem:[#allocation2 + $0x90] sm:$0xff] %vm750_vm2, %v744_v21 }
 0x2ba   : > { %v2671_v22 = vpop.xlane.xlu0 %808 }
 0x2be   : > { %v2673_v23 = vpop.xlane.xlu1 %811  ;;  %v2675_v24 = vpop.xlane.xlu0 %814 }
 0x2c2   : > { %v2677_v25 = vpop.xlane.xlu1 %817  ;;  %v958_v26 = vpop.xlane.xlu0 %957 }
 0x2c3   : > { %v968_v27 = vsub.f32 %v950_v52, %v958_v26  ;;  %v1137_v52 = vsel %vm750_vm2, %v1131_v46, -inf }
 0x2c5   : > { %v972_v28 = vmul.f32 1.442695, %v968_v27 }
 0x2c6   : > { %v961_v29 = vpop.xlane.xlu1 %960  ;;  %v964_v30 = vpop.xlane.xlu0 %963 }
 0x2c7   : > { %2090 = vpow2.f32 %v972_v28  ;;  %v969_v31 = vsub.f32 %v951_v57, %v961_v29  ;;  %v970_v32 = vsub.f32 %v952_v58, %v964_v30  ;;  %v1143_v57 = vsel %vm750_vm2, %v1133_v53, -inf }
 0x2c8   : > { %v1313_v58 = vunpack.c.l.bf16 %v2709_v54 }
 0x2c9   : > { %v974_v33 = vmul.f32 1.442695, %v969_v31  ;;  %v976_v34 = vmul.f32 1.442695, %v970_v32  ;;  %v954_v32 = vld [vmem:[#allocation2 + $0x90] sm:$0xff] }
 0x2ca   : > { %v967_v35 = vpop.xlane.xlu1 %966 }
 0x2cb   : > { %2092 = vpow2.f32 %v974_v33  ;;  %v971_v36 = vsub.f32 %v953_v61, %v967_v35  ;;  %v1319_v61 = vsel %vm750_vm2, %v1313_v58, -inf  ;;  %v955_v35 = vld [vmem:[#allocation2 + $0x98] sm:$0xff] }
 0x2cc   : > { %2094 = vpow2.f32 %v976_v34  ;;  %v1005_v34 = vsel %vm750_vm2, %v954_v32, 0 }
 0x2cd   : > { %v978_v37 = vmul.f32 1.442695, %v971_v36  ;;  %v1008_v36 = vsel %vm750_vm2, %v955_v35, 0 }
 0x2cf   : > { %2096 = vpow2.f32 %v978_v37 }
 0x2d0   : > { %2098 = vrcp.f32 %v2675_v24 }
 0x2d1   : > { %v2679_v38 = vpop.eup %2090  ;;  %2100 = vrcp.f32 %v2671_v22 }
 0x2d2   : > { %v980_v39 = vsel %vm750_vm2, %v2679_v38, 0.0  ;;  %2102 = vrcp.f32 %v2677_v25 }
 0x2d3   : > { %981 = vadd.xlane.f32.xlu0 %v980_v39  ;;  %2104 = vrcp.f32 %v2673_v23 }
 0x2d5   : > { %v2685_v41 = vpop.eup %2092 }
 0x2d6   : > { %v2687_v42 = vpop.eup %2094  ;;  %v983_v43 = vsel %vm750_vm2, %v2685_v41, 0.0  ;;  %v996_v44 = vpack.c.bf16 %v2685_v41, %v2679_v38 }
 0x2d7   : > { %984 = vadd.xlane.f32.xlu1 %v983_v43  ;;  %v986_v45 = vsel %vm750_vm2, %v2687_v42, 0.0 }
 0x2d8   : > { %987 = vadd.xlane.f32.xlu0 %v986_v45 }
 0x2d9   : > { %v2698_v48 = vpop.eup %2096 }
 0x2da   : > { %v989_v49 = vsel %vm750_vm2, %v2698_v48, 0.0  ;;  %v997_v51 = vpack.c.bf16 %v2698_v48, %v2687_v42  ;;  %v2099_v12 = vpop.eup %2098 }
 0x2db   : > { %990 = vadd.xlane.f32.xlu1 %v989_v49  ;;  %v2101_v13 = vpop.eup %2100  ;;  %v888_v17 = vmul.f32 0.17677669, %v2099_v12 }
 0x2dc   : > { %1138 = vmax.xlane.f32.xlu0 %v1137_v52  ;;  %v2103_v14 = vpop.eup %2102  ;;  %v886_v19 = vmul.f32 0.17677669, %v2101_v13 }
 0x2dd   : > { %v2105_v15 = vpop.eup %2104  ;;  %v889_v26 = vmul.f32 0.17677669, %v2103_v14 }
 0x2de   : > { %v887_v22 = vmul.f32 0.17677669, %v2105_v15 }
 0x2df   : > { %1141 = vmax.xlane.f32.xlu1 %v1140_v55 }
 0x2e0   : > { %1144 = vmax.xlane.f32.xlu0 %v1143_v57 }
 0x2e3   : > { %1147 = vmax.xlane.f32.xlu1 %v1146_v59 }
 0x2e4   : > { %1320 = vmax.xlane.f32.xlu0 %v1319_v61 }
 0x2e7   : > { %1323 = vmax.xlane.f32.xlu1 %v1322_v63 }
 0x2eb   : > { %1326 = vmax.xlane.f32.xlu1 %v1325_v1 }
 0x2ef   : > { %1329 = vmax.xlane.f32.xlu1 %v1328_v6 }
 0x2fa   : > { %1077 = vrot.lane.b32.xlu0 %v1076_v11, %s2345_s21 }
 0x306   : > { %v1880_v18 = vpop.f32.mrb[8].mxu1 }
 0x307   : > { %v892_v20 = vmul.f32 %v1880_v18, %v888_v17  ;;  %v871_v21 = vpop.f32.mrb[9].mxu1 }
 0x308   : > { %v890_v24 = vmul.f32 %v886_v19, %v871_v21  ;;  %v1881_v27 = vpop.f32.mrb[10].mxu1 }
 0x309   : > { %v893_v28 = vmul.f32 %v1881_v27, %v889_v26  ;;  %v874_v25 = vpop.f32.mrb[11].mxu1  ;;  %v1513_v26 = vld [vmem:[#allocation2 + $0x8] sm:$0xff]  ;;  %v1514_v27 = vld [vmem:[#allocation2 + $0x10] sm:$0xff] }
 0x30a   : > { %v891_v29 = vmul.f32 %v887_v22, %v874_v25  ;;  %v1515_v22 = vld [vmem:[#allocation2 + $0x18] sm:$0xff]  ;;  %v1517_v25 = vld [vmem:[#allocation2 + $0x28] sm:$0xff] }
 0x30b   : > { %v896_v30 = vpack.c.bf16 %v893_v28, %v892_v20  ;;  %v1512_v20 = vld [vmem:[#allocation2] sm:$0xff] }
 0x30c   : > { %v895_v31 = vpack.c.bf16 %v891_v29, %v890_v24  ;;  %v1516_v28 = vld [vmem:[#allocation2 + $0x20] sm:$0xff]  ;;  %v1518_v29 = vld [vmem:[#allocation2 + $0x30] sm:$0xff] }
 0x30d   : > { %v905_v33 = vsel %vm897_vm4, %v896_v30, 0  ;;  %v1519_v30 = vld [vmem:[#allocation2 + $0x38] sm:$0xff] }
 0x30e   : > { %v902_v23 = vsel %vm897_vm4, %v895_v31, 0  ;;  %v1752_v31 = vld.sshfl [vmem:[#allocation8] sm:$0x3 pattern:$0x76325410] }
 0x30f   : > { %1883 = vmatpush3.bf16.xpose.msra.mxu1 %v902_v23 }
 0x310   : > { %1884 = vmatprep.subr.bf16.mxu1 %v2342_v16 }
 0x317   : > { %1885 = vmatpush3.bf16.xpose.msra.mxu1 %v905_v33 }
 0x318   : > { %1964 = vmatprep.subr.msk.bf16.mxu1 %vm750_vm2, %v954_v32 }
 0x31e   : > { %1887 = vmatmul.mubr.msk.bf16.vlgmr.msra.gmra.mrb[12].mxu1 %vm897_vm4, %v894_v10 }
 0x31f   : > { %1891 = vmatpush3.bf16.xpose.msra.mxu1 %v1005_v34  ;;  %1894 = vmatprep.mubr.msk.bf16.mxu1 %vm750_vm2, %v996_v44 }
 0x320   : > { %1965 = vmatprep.subr.msk.bf16.mxu1 %vm750_vm2, %v955_v35 }
 0x327   : > { %1893 = vmatpush3.bf16.xpose.msra.mxu1 %v1008_v36 }
 0x328   : > { %1898 = vmatprep.subr.bf16.mxu1 %v2342_v16 }
 0x32e   : > { %1895 = vmatmul.mubr.msk.bf16.vlgmr.msra.gmra.mrb[16].mxu1 %vm750_vm2, %v997_v51 }
 0x32f   : > { %1902 = vmatprep.mubr.msk.bf16.mxu1 %vm2343_vm3, %v2342_v16 }
 0x360   : > { %v2763_v37 = vpop.xlane.xlu0 %981 }
 0x364   : > { %v2765_v38 = vpop.xlane.xlu1 %984 }
 0x365   : > { %v2767_v39 = vpop.xlane.xlu0 %987 }
 0x368   : > { %v2769_v41 = vpop.xlane.xlu1 %990 }
 0x369   : > { %v1139_v43 = vpop.xlane.xlu0 %1138 }
 0x36a   : > { %v1149_v44 = vsub.f32 %v1131_v46, %v1139_v43 }
 0x36c   : > { %v1153_v45 = vmul.f32 1.442695, %v1149_v44  ;;  %v1142_v49 = vpop.xlane.xlu1 %1141 }
 0x36d   : > { %v1150_v42 = vsub.f32 %v1132_v50, %v1142_v49  ;;  %v1145_v48 = vpop.xlane.xlu0 %1144 }
 0x36e   : > { %v1151_v51 = vsub.f32 %v1133_v53, %v1145_v48  ;;  %2106 = vpow2.f32 %v1153_v45 }
 0x36f   : > { %v1155_v52 = vmul.f32 1.442695, %v1150_v42 }
 0x370   : > { %v1157_v55 = vmul.f32 1.442695, %v1151_v51  ;;  %v1148_v57 = vpop.xlane.xlu1 %1147 }
 0x371   : > { %2108 = vpow2.f32 %v1155_v52  ;;  %v1152_v59 = vsub.f32 %v1134_v56, %v1148_v57  ;;  %v1321_v61 = vpop.xlane.xlu0 %1320 }
 0x372   : > { %2110 = vpow2.f32 %v1157_v55  ;;  %v1331_v46 = vsub.f32 %v1313_v58, %v1321_v61 }
 0x373   : > { %v1159_v63 = vmul.f32 1.442695, %v1152_v59 }
 0x374   : > { %v1335_v40 = vmul.f32 1.442695, %v1331_v46  ;;  %v1324_v50 = vpop.xlane.xlu1 %1323 }
 0x375   : > { %2112 = vpow2.f32 %v1159_v63  ;;  %v1332_v53 = vsub.f32 %v1314_v60, %v1324_v50  ;;  %v1078_v50 = vpop.permute.xlu0 %1077 }
 0x376   : > { %2114 = vpow2.f32 %v1335_v40  ;;  %v1135_v40 = vld [vmem:[#allocation2 + $0xa0] sm:$0xff] }
 0x377   : > { %v1337_v1 = vmul.f32 1.442695, %v1332_v53  ;;  %v1186_v53 = vsel %vm750_vm2, %v1135_v40, 0 }
 0x378   : > { %v1327_v3 = vpop.xlane.xlu1 %1326  ;;  %v2785_v56 = vpop.eup %2106 }
 0x379   : > { %2116 = vpow2.f32 %v1337_v1  ;;  %v1333_v47 = vsub.f32 %v1315_v0, %v1327_v3  ;;  %v1161_v13 = vsel %vm750_vm2, %v2785_v56, 0.0  ;;  %v1136_v1 = vld [vmem:[#allocation2 + $0xa8] sm:$0xff] }
 0x37a   : > { %v1189_v3 = vsel %vm750_vm2, %v1136_v1, 0 }
 0x37b   : > { %v2787_v4 = vpop.eup %2108  ;;  %v1339_v58 = vmul.f32 1.442695, %v1333_v47 }
 0x37c   : > { %v2789_v5 = vpop.eup %2110  ;;  %v1330_v6 = vpop.xlane.xlu1 %1329  ;;  %v1177_v7 = vpack.c.bf16 %v2787_v4, %v2785_v56  ;;  %v1164_v14 = vsel %vm750_vm2, %v2787_v4, 0.0 }
 0x37d   : > { %v1334_v54 = vsub.f32 %v1316_v2, %v1330_v6  ;;  %v1167_v60 = vsel %vm750_vm2, %v2789_v5, 0.0  ;;  %2118 = vpow2.f32 %v1339_v58 }
 0x37e   : > { %1168 = vadd.xlane.f32.xlu1 %v1167_v60 }
 0x37f   : > { %v2797_v8 = vpop.eup %2112  ;;  %v1341_v0 = vmul.f32 1.442695, %v1334_v54 }
 0x380   : > { %v2115_v9 = vpop.eup %2114  ;;  %v1170_v10 = vsel %vm750_vm2, %v2797_v8, 0.0  ;;  %v1178_v11 = vpack.c.bf16 %v2797_v8, %v2789_v5 }
 0x381   : > { %2120 = vpow2.f32 %v1341_v0  ;;  %v1343_v12 = vsel %vm750_vm2, %v2115_v9, 0.0 }
 0x382   : > { %1171 = vadd.xlane.f32.xlu1 %v1170_v10  ;;  %1344 = vadd.xlane.f32.xlu0 %v1343_v12  ;;  %2122 = vrcp.f32 %v2767_v39 }
 0x383   : > { %v2117_v62 = vpop.eup %2116  ;;  %2124 = vrcp.f32 %v2763_v37 }
 0x384   : > { %v1359_v2 = vpack.c.bf16 %v2117_v62, %v2115_v9  ;;  %v1346_v24 = vsel %vm750_vm2, %v2117_v62, 0.0  ;;  %2126 = vrcp.f32 %v2769_v41 }
 0x385   : > { %2128 = vrcp.f32 %v2765_v38 }
 0x386   : > { %1162 = vadd.xlane.f32.xlu1 %v1161_v13  ;;  %1926 = vmatprep.mubr.msk.bf16.mxu0 %vm750_vm2, %v1359_v2 }
 0x387   : > { %v2119_v15 = vpop.eup %2118 }
 0x388   : > { %v1349_v19 = vsel %vm750_vm2, %v2119_v15, 0.0 }
 0x38a   : > { %1165 = vadd.xlane.f32.xlu1 %v1164_v14 }
 0x38b   : > { %v2121_v17 = vpop.eup %2120 }
 0x38c   : > { %v1360_v18 = vpack.c.bf16 %v2121_v17, %v2119_v15  ;;  %v1352_v21 = vsel %vm750_vm2, %v2121_v17, 0.0  ;;  %v2123_v35 = vpop.eup %2122 }
 0x38d   : > { %v2125_v36 = vpop.eup %2124  ;;  %v1061_v45 = vmul.f32 0.17677669, %v2123_v35 }
 0x38e   : > { %1350 = vadd.xlane.f32.xlu1 %v1349_v19  ;;  %1927 = vmatmul.mubr.msk.bf16.vlgmr.msra.gmra.mrb[40].mxu0 %vm750_vm2, %v1360_v18  ;;  %v2127_v43 = vpop.eup %2126  ;;  %v1059_v42 = vmul.f32 0.17677669, %v2125_v36 }
 0x38f   : > { %1939 = vmatpush3.bf16.msra.mxu0 %v1512_v20  ;;  %1954 = vmatprep.mubr.msk.bf16.mxu0 %vm2343_vm3, %v2342_v16  ;;  %v2129_v44 = vpop.eup %2128  ;;  %v1062_v52 = vmul.f32 0.17677669, %v2127_v43 }
 0x390   : > { %1940 = vmatprep.subr.bf16.mxu0 %v2342_v16  ;;  %v1060_v57 = vmul.f32 0.17677669, %v2129_v44 }
 0x392   : > { %1353 = vadd.xlane.f32.xlu1 %v1352_v21 }
 0x393   : > { %1941 = vmatpush3.bf16.msra.mxu0 %v1513_v26 }
 0x394   : > { %1942 = vmatprep.subr.bf16.mxu0 %v2342_v16 }
 0x396   : > { %1347 = vadd.xlane.f32.xlu1 %v1346_v24 }
 0x397   : > { %1943 = vmatpush3.bf16.msra.mxu0 %v1514_v27 }
 0x398   : > { %1944 = vmatprep.subr.bf16.mxu0 %v2342_v16  ;;  %1441 = vrot.lane.b32.xlu0 %v1752_v31, %s2347_s24 }
 0x39b   : > { %1945 = vmatpush3.bf16.msra.mxu0 %v1515_v22 }
 0x39c   : > { %1946 = vmatprep.subr.bf16.mxu0 %v2342_v16 }
 0x39f   : > { %1947 = vmatpush3.bf16.msra.mxu0 %v1516_v28 }
 0x3a0   : > { %1948 = vmatprep.subr.bf16.mxu0 %v2342_v16 }
 0x3a3   : > { %1949 = vmatpush3.bf16.msra.mxu0 %v1517_v25 }
 0x3a4   : > { %1950 = vmatprep.subr.bf16.mxu0 %v2342_v16 }
 0x3a7   : > { %1951 = vmatpush3.bf16.msra.mxu0 %v1518_v29  ;;  %1259 = vrot.lane.b32.xlu1 %v1752_v31, %s2346_s23 }
 0x3a8   : > { %1952 = vmatprep.subr.bf16.mxu0 %v2342_v16 }
 0x3ab   : > { %1953 = vmatpush3.bf16.msra.mxu0 %v1519_v30 }
 0x3f1   : > { %v2824_v23 = vpop.f32.mrb[12].mxu1 }
 0x3f2   : > { %v1888_v32 = vpop.f32.mrb[13].mxu1 }
 0x3f3   : > { %v944_v33 = vpop.f32.mrb[14].mxu1 }
 0x3f4   : > { %v1889_v34 = vpop.f32.mrb[15].mxu1 }
 0x401   : > { %v1896_v49 = vpop.f32.mrb[16].mxu1 }
 0x402   : > { %v1065_v48 = vmul.f32 %v1896_v49, %v1061_v45  ;;  %v1044_v51 = vpop.f32.mrb[17].mxu1 }
 0x403   : > { %v1063_v55 = vmul.f32 %v1059_v42, %v1044_v51  ;;  %v1897_v39 = vpop.f32.mrb[18].mxu1 }
 0x404   : > { %v1066_v59 = vmul.f32 %v1897_v39, %v1062_v52  ;;  %v1047_v37 = vpop.f32.mrb[19].mxu1 }
 0x405   : > { %v1064_v61 = vmul.f32 %v1060_v57, %v1047_v37 }
 0x406   : > { %v1068_v46 = vpack.c.bf16 %v1066_v59, %v1065_v48 }
 0x407   : > { %v1067_v41 = vpack.c.bf16 %v1064_v61, %v1063_v55 }
 0x408   : > { %v1086_v63 = vsel %vm897_vm4, %v1068_v46, 0 }
 0x409   : > { %v1083_v38 = vsel %vm897_vm4, %v1067_v41, 0 }
 0x40a   : > { %1899 = vmatpush3.bf16.xpose.msra.mxu1 %v1083_v38 }
 0x40b   : > { %1900 = vmatprep.subr.bf16.mxu1 %v2342_v16  ;;  %v1169_v47 = vpop.xlane.xlu1 %1168 }
 0x40f   : > { %v1172_v56 = vpop.xlane.xlu1 %1171  ;;  %v1345_v54 = vpop.xlane.xlu0 %1344 }
 0x410   : > { %2130 = vrcp.f32 %v1345_v54  ;;  %v947_v54 = vpack.c.bf16 %v2824_v23, %v2824_v23 }
 0x412   : > { %1901 = vmatpush3.bf16.xpose.msra.mxu1 %v1086_v63 }
 0x413   : > { %1966 = vmatprep.subr.msk.bf16.mxu1 %vm750_vm2, %v1135_v40  ;;  %v1163_v4 = vpop.xlane.xlu1 %1162  ;;  %v1442_v41 = vpop.permute.xlu0 %1441 }
 0x417   : > { %v1166_v58 = vpop.xlane.xlu1 %1165 }
 0x419   : > { %1903 = vmatmul.mubr.msk.bf16.vlgmr.msra.gmra.mrb[20].mxu1 %vm897_vm4, %v1078_v50 }
 0x41a   : > { %1907 = vmatpush3.bf16.xpose.msra.mxu1 %v1186_v53  ;;  %1910 = vmatprep.mubr.msk.bf16.mxu1 %vm750_vm2, %v1177_v7  ;;  %v2131_v0 = vpop.eup %2130 }
 0x41b   : > { %1967 = vmatprep.subr.msk.bf16.mxu1 %vm750_vm2, %v1136_v1  ;;  %v1351_v6 = vpop.xlane.xlu1 %1350  ;;  %v1422_v2 = vmul.f32 0.17677669, %v2131_v0  ;;  %v2348_v1 = vmov 0  }
 0x41c   : > { %2132 = vrcp.f32 %v1351_v6  ;;  %2056 = vset.pattern.permute.xlu1 %v2348_v1  ;;  %2057 = vset.pattern.permute.xlu0 %v2348_v1 }
 0x41f   : > { %v1354_v7 = vpop.xlane.xlu1 %1353 }
 0x420   : > { %2134 = vrcp.f32 %v1354_v7 }
 0x422   : > { %1909 = vmatpush3.bf16.xpose.msra.mxu1 %v1189_v3 }
 0x423   : > { %1914 = vmatprep.subr.bf16.mxu1 %v2342_v16  ;;  %v1348_v60 = vpop.xlane.xlu1 %1347 }
 0x424   : > { %2136 = vrcp.f32 %v1348_v60 }
 0x425   : > { %2138 = vrcp.f32 %v1169_v47 }
 0x426   : > { %v2133_v9 = vpop.eup %2132  ;;  %2140 = vrcp.f32 %v1172_v56 }
 0x427   : > { %2142 = vrcp.f32 %v1163_v4  ;;  %v1260_v37 = vpop.permute.xlu1 %1259 }
 0x428   : > { %2144 = vrcp.f32 %v1166_v58  ;;  %v1520_v58 = vld [vmem:[#allocation9] sm:$0xf] }
 0x429   : > { %1911 = vmatmul.mubr.msk.bf16.vlgmr.msra.gmra.mrb[24].mxu1 %vm750_vm2, %v1178_v11  ;;  %v1424_v11 = vmul.f32 0.17677669, %v2133_v9 }
 0x42a   : > { %1918 = vmatprep.mubr.msk.bf16.mxu1 %vm2343_vm3, %v2342_v16  ;;  %v2135_v5 = vpop.eup %2134 }
 0x42b   : > { %v1425_v62 = vmul.f32 0.17677669, %v2135_v5 }
 0x42e   : > { %v2137_v8 = vpop.eup %2136 }
 0x42f   : > { %v1423_v14 = vmul.f32 0.17677669, %v2137_v8  ;;  %v2139_v29 = vpop.eup %2138 }
 0x430   : > { %v2141_v30 = vpop.eup %2140  ;;  %v1242_v34 = vmul.f32 0.17677669, %v2139_v29 }
 0x431   : > { %v2143_v31 = vpop.eup %2142  ;;  %v1243_v36 = vmul.f32 0.17677669, %v2141_v30 }
 0x432   : > { %v2145_v32 = vpop.eup %2144  ;;  %v1240_v43 = vmul.f32 0.17677669, %v2143_v31 }
 0x433   : > { %v1241_v45 = vmul.f32 0.17677669, %v2145_v32 }
 0x461   : > { %v1928_v10 = vpop.f32.mrb[40].mxu0 }
 0x462   : > { %v1407_v12 = vpop.f32.mrb[41].mxu0  ;;  %v1428_v15 = vmul.f32 %v1928_v10, %v1424_v11 }
 0x463   : > { %v1929_v13 = vpop.f32.mrb[42].mxu0  ;;  %v1426_v19 = vmul.f32 %v1422_v2, %v1407_v12 }
 0x464   : > { %v1429_v17 = vmul.f32 %v1929_v13, %v1425_v62  ;;  %v1410_v18 = vpop.f32.mrb[43].mxu0 }
 0x465   : > { %v1427_v20 = vmul.f32 %v1423_v14, %v1410_v18 }
 0x466   : > { %v1432_v21 = vpack.c.bf16 %v1429_v17, %v1428_v15 }
 0x467   : > { %v1431_v26 = vpack.c.bf16 %v1427_v20, %v1426_v19 }
 0x468   : > { %v1450_v46 = vsel %vm897_vm4, %v1432_v21, 0 }
 0x469   : > { %v1447_v61 = vsel %vm897_vm4, %v1431_v26, 0 }
 0x4ec   : > { %v1122_v24 = vpop.f32.mrb[20].mxu1 }
 0x4ed   : > { %v1128_v27 = vpack.c.bf16 %v1122_v24, %v1122_v24  ;;  %v1904_v22 = vpop.f32.mrb[21].mxu1 }
 0x4ee   : > { %v1125_v28 = vpop.f32.mrb[22].mxu1 }
 0x4ef   : > { %1494 = vrot.lane.b32.xlu1 %v1128_v27, %s2347_s24  ;;  %v1905_v25 = vpop.f32.mrb[23].mxu1 }
 0x4fc   : > { %v1912_v33 = vpop.f32.mrb[24].mxu1 }
 0x4fd   : > { %v1225_v35 = vpop.f32.mrb[25].mxu1  ;;  %v1246_v49 = vmul.f32 %v1912_v33, %v1242_v34 }
 0x4fe   : > { %v1913_v44 = vpop.f32.mrb[26].mxu1  ;;  %v1244_v51 = vmul.f32 %v1240_v43, %v1225_v35 }
 0x4ff   : > { %v1247_v42 = vmul.f32 %v1913_v44, %v1243_v36  ;;  %v1228_v48 = vpop.f32.mrb[27].mxu1 }
 0x500   : > { %v1245_v52 = vmul.f32 %v1241_v45, %v1228_v48 }
 0x501   : > { %v1250_v55 = vpack.c.bf16 %v1247_v42, %v1246_v49 }
 0x502   : > { %v1249_v39 = vpack.c.bf16 %v1245_v52, %v1244_v51 }
 0x503   : > { %v1268_v59 = vsel %vm897_vm4, %v1250_v55, 0 }
 0x504   : > { %v1265_v57 = vsel %vm897_vm4, %v1249_v39, 0 }
 0x505   : > { %1915 = vmatpush3.bf16.xpose.msra.mxu1 %v1265_v57 }
 0x506   : > { %1916 = vmatprep.subr.bf16.mxu1 %v2342_v16 }
 0x50d   : > { %1917 = vmatpush3.bf16.xpose.msra.mxu1 %v1268_v59 }
 0x50e   : > { %1930 = vmatprep.subr.bf16.mxu1 %v2342_v16 }
 0x514   : > { %1919 = vmatmul.mubr.msk.bf16.vlgmr.msra.gmra.mrb[28].mxu1 %vm897_vm4, %v1260_v37 }
 0x515   : > { %1931 = vmatpush3.bf16.xpose.msra.mxu1 %v1447_v61  ;;  %1934 = vmatprep.mubr.msk.bf16.mxu1 %vm2343_vm3, %v2342_v16 }
 0x516   : > { %1932 = vmatprep.subr.bf16.mxu1 %v2342_v16 }
 0x51d   : > { %1933 = vmatpush3.bf16.xpose.msra.mxu1 %v1450_v46 }
 0x524   : > { %1935 = vmatmul.mubr.msk.bf16.vlgmr.msra.gmra.mrb[32].mxu1 %vm897_vm4, %v1442_v41 }
 0x561   : > { %v1495_v6 = vpop.permute.xlu1 %1494 }
 0x562   : > { %v1504_v60 = vsel %vm897_vm4, %v947_v54, %v1495_v6 }
 0x5e7   : > { %v1304_v38 = vpop.f32.mrb[28].mxu1 }
 0x5e8   : > { %v1310_v63 = vpack.c.bf16 %v1304_v38, %v1304_v38  ;;  %v1920_v40 = vpop.f32.mrb[29].mxu1 }
 0x5e9   : > { %v1307_v50 = vpop.f32.mrb[30].mxu1 }
 0x5ea   : > { %1497 = vrot.lane.b32.xlu1 %v1310_v63, %s2346_s23  ;;  %v1921_v53 = vpop.f32.mrb[31].mxu1 }
 0x5f7   : > { %v1486_v3 = vpop.f32.mrb[32].mxu1 }
 0x5f8   : > { %v1492_v47 = vpack.c.bf16 %v1486_v3, %v1486_v3  ;;  %v1936_v56 = vpop.f32.mrb[33].mxu1 }
 0x5f9   : > { %v1489_v16 = vpop.f32.mrb[34].mxu1 }
 0x5fa   : > { %1500 = vrot.lane.b32.xlu1 %v1492_v47, %s2345_s21  ;;  %v1937_v4 = vpop.f32.mrb[35].mxu1 }
 0x5fe   : > { %1523 = vperm.xlu1 %2056, %v1520_v58  }
 0x65c   : > { %v1498_v7 = vpop.permute.xlu1 %1497 }
 0x65d   : > { %v1507_v0 = vsel %vm1505_vm5, %v1504_v60, %v1498_v7 }
 0x66c   : > { %v1501_v9 = vpop.permute.xlu1 %1500 }
 0x66d   : > { %v1510_v5 = vsel %vm1508_vm6, %v1507_v0, %v1501_v9 }
 0x66e   : > { %1955 = vmatmul.mubr.bf16.vlgmr.msra.gmra.mrb[44].mxu0 %v1510_v5 }
 0x67d   : > { %v1524_v8 = vpop.permute.xlu1 %1523 }
 0x741   : > { %v1560_v10 = vpop.f32.mrb[44].mxu0 }
 0x742   : > { %v1561_v11 = vadd.f32 %v1560_v10, %v1524_v8  ;;  %v1956_v12 = vpop.f32.mrb[45].mxu0 }
 0x743   : > { %v1563_v62 = vpop.f32.mrb[46].mxu0 }
 0x744   : > { %v1566_v23 = vpack.c.bf16 %v1561_v11, %v1561_v11  ;;  %v1957_v2 = vpop.f32.mrb[47].mxu0 }
 0x746   : > { %1568 = vst.msk [vmem:[%s252_s6] sm:$0x3] %vm1567_vm7, %v1566_v23 }
 0x747   : > { %2273 = shalt.err (!%p2270_p4)
}
 0x748   : > { %s2274_s27 = scalar_lea.hbm %s2871_s12, 32  ;;  %s2278_s21 = scalar_lea.hbm %s2919_s4, 64 }
 0x749   : > { %p2275_p0 = scmp.ne.s32.totalorder %s2871_s12, %s2274_s27  ;;  %p2279_p11 = scmp.lt.u32.totalorder %s2871_s12, %s2919_s4 }
 0x74a   : > { %p2280_p13 = scmp.lt.u32.totalorder %s2278_s21, %s2274_s27  ;;  %p2282_p10 = scmp.lt.u32.totalorder %s2274_s27, %s2871_s12 }
 0x74b   : > { %p2276_p9 = pnand %p2275_p0, %p2520_p5 }
 0x74c   : > { %p2281_p6 = por %p2280_p13, %p2279_p11 }
 0x74d   : > { %p2277_p8 = pneg %p2276_p9 }
 0x74e   : > { %p2283_p3 = por %p2282_p10, %p2281_p6 }
 0x750   : > { %p2284_p7 = pnand %p2283_p3, %p2277_p8 }
 0x752   : > { %2287 = shalt.err (!%p2284_p7)
}
 0x753   : > { %1984 = dma.vmem_to_hbm [thread:$0]  (%p2520_p5), %s2873_s9, 32, %s2871_s12, %s1570_s19  }
 0x754 PF: > { %s1595_s29 = sand.u32 1, %s2322_s15   ;;  %p2937_p12 = scmp.ne.s32.totalorder %s2924_s22, 0 }
 0x755   : > { %p2938_p2 = scmp.ge.s32.totalorder %s2334_s18, 2  ;;  %s1596_s5 = scalar_lea.sflag [#allocation5], %s1595_s29 }
 0x757   : > { %p2001_p1 = pnand %p2938_p2, %p2937_p12 }
 0x759   : > { %2317 = dma.done.wait (!%p2001_p1), %s1596_s5, 32  }
 0x75a   : > { %2319 = vsyncadd (!%p2001_p1), %s1596_s5, 4294967264  ;;  %p19_p4 = scmp.ge.s32.totalorder %s2506_s10, 4   ;;  %s2939_s15 = smov %s2326_s16 }
 0x75b   : > { %s2940_s16 = smov %s2330_s17  ;;  %s2941_s17 = smov %s2516_s11 }
 0x75c   : > { %s2942_s18 = smov %s2506_s10  ;;  %21 = sbr.rel (!%p19_p4) target bundleno = 7 (0x7), region = 93 }
 0x763   :  { %1601 = vsyncpa [#allocation4], 1 }
 0x764   :  { %1603 = vsyncpa [#allocation4 + $0x1], 1 }
 0x765   :  { %1604 = vsyncpa [#allocation7], 1 }
 0x766   :  { %1605 = vsyncpa [#allocation10], 1 }
 0x767   :  { %1606 = vsyncpa [#allocation5], 1 }
 0x768   :  { %1608 = vsyncpa [#allocation5 + $0x1], 1 }

</bundles_post_ra>
